<compile_context>
chip_gen: v5e
topology: v5e:2x2
jax: 0.10.0
libtpu: 0.0.40
codegen_flags: <defaults>
</compile_context>

<pallas_src>
import functools

import jax
import jax.numpy as jnp
from jax.experimental import pallas as pl
from jax.experimental.pallas import tpu as pltpu


def _lstm_model_kernel(x_ref, z1pre_ref, r_ref, wg_ref, bg_ref,
                       w1a_ref, w1c_ref, w2_ref, b2_ref,
                       w3_ref, b3_ref, wfc_ref, bfc_ref,
                       out_ref, last_ref, *, lookback, slots):
    """One grid step = one group of contract slots, all batched along the row axis.

    x_ref     : (1, B, L*S_g, CS)   contracts, rows ordered (l-major, slot-minor)
    z1pre_ref : (1, B*S_g, RH1)     hidden_intensity @ w1b + b1 (precomputed)
    r_ref     : (B*S_g, SA)         conditioning, replicated per slot row
    wg_ref    : (4, CS+H, H)        fused-K LSTM gate weights, torch order i,f,g,o
    bg_ref    : (4, 1, H)           b_ih + b_hh per gate
    out_ref   : (1, B*S_g, SA)
    last_ref  : VMEM (B*S_g, H)     scratch for lstm_hidden[:, -1, :] rows
    """
    L, S_g = lookback, slots
    B = x_ref.shape[1]
    R = x_ref.shape[2]                 # = L * S_g
    H = last_ref.shape[1]
    SA = r_ref.shape[1]
    last_lo = (L - 1) * S_g

    def mm(a, b):
        return jnp.dot(a, b, preferred_element_type=jnp.float32)

    # Resident weights: load once, reuse across the whole unrolled recurrence.
    wg_i, wg_f, wg_g, wg_o = wg_ref[0], wg_ref[1], wg_ref[2], wg_ref[3]
    bg_i, bg_f, bg_g, bg_o = bg_ref[0], bg_ref[1], bg_ref[2], bg_ref[3]
    w1a, w1c = w1a_ref[...], w1c_ref[...]
    w2, b2 = w2_ref[...], b2_ref[...]
    w3, b3 = w3_ref[...], b3_ref[...]
    wfc, bfc = wfc_ref[...], bfc_ref[...]
    z1pre = z1pre_ref[0]                                   # (B*S_g, RH1)

    contracts = x_ref[0]                                   # (B, L*S_g, CS), value-carried
    out_cols = []
    # TODO(synk): convert these Python unrolls to lax.fori_loop(..., unroll=True) with
    # (h, c, contracts) carries if B (the LSTM time axis) or steps_ahead grow large.
    for j in range(SA):
        # Fresh LSTM state every autoregressive step, batched over every contract slot.
        h = jnp.zeros((R, H), jnp.float32)
        c = jnp.zeros((R, H), jnp.float32)
        for t in range(B):                                 # nn.LSTM time axis == B
            xh = jnp.concatenate([contracts[t], h], axis=1)        # fused K = CS + H
            gi = jax.nn.sigmoid(mm(xh, wg_i) + bg_i)
            gf = jax.nn.sigmoid(mm(xh, wg_f) + bg_f)
            gg = jnp.tanh(mm(xh, wg_g) + bg_g)
            go = jax.nn.sigmoid(mm(xh, wg_o) + bg_o)
            c = gf * c + gi * gg
            h = go * jnp.tanh(c)
            # lstm_hidden[:, -1, :] -> rows with l == L-1 (a contiguous sublane block);
            # store directly into the scratch instead of list+concatenate.
            last_ref[t * S_g:(t + 1) * S_g, :] = h[last_lo:last_lo + S_g, :]

        lstm_last = last_ref[...]                          # (B*S_g, H), rows (b, slot)
        rj = r_ref[:, j:j + 1]                             # (B*S_g, 1)

        # Regressor: Linear -> ReLU -> Linear -> ReLU -> Linear, with the
        # hidden_intensity part of layer 1 pre-folded into z1pre.
        z1 = jnp.maximum(mm(lstm_last, w1a) + z1pre + rj * w1c, 0.0)
        z2 = jnp.maximum(mm(z1, w2) + b2, 0.0)
        prediction = mm(z2, w3) + b3                       # (B*S_g, CS)

        # pred[:, n, j] += fc(relu(prediction)).squeeze()
        out_cols.append(mm(jnp.maximum(prediction, 0.0), wfc) + bfc)   # (B*S_g, 1)

        if j + 1 < SA:
            # contract <- cat([contract[:, 1:, :], prediction], dim=1):
            # drop the l=0 row block, append prediction as the new l=L-1 block.
            pred_b = prediction.reshape(B, S_g, prediction.shape[1])
            contracts = jnp.concatenate([contracts[:, S_g:, :], pred_b], axis=1)

    out_ref[0] = jnp.concatenate(out_cols, axis=1)         # single (B*S_g, SA) store


def lstm_model_forward(x, hidden_intensity, r, params, *,
                       contract_size, steps_ahead, num_groups=1):
    """Pallas implementation of LSTMModel.forward. Returns (B, num_nodes, steps_ahead)."""
    B, L, N, W = x.shape
    CS = contract_size
    MC = W // CS
    H = params["w_hh"].shape[1]
    SA = steps_ahead
    RH1 = params["w1"].shape[0]

    S = N * MC                                  # total contract slots
    NG = num_groups                             # grid steps ("parallel" -> one per core)
    S_g = -(-S // NG)                           # slots per group ...
    S_g = -(-S_g // 8) * 8                      # ... rounded up to a sublane multiple
    S_tot = NG * S_g

    # --- break semantics: slot (n, i) contributes iff contracts 0..i are all nonzero ---
    x5 = x.reshape(B, L, N, MC, CS)
    nonzero = jnp.any(x5 != 0, axis=(0, 1, 4)).astype(jnp.float32)       # (N, MC)
    mask = jnp.cumprod(nonzero, axis=1).reshape(S)                       # (N*MC,)

    # --- contracts -> (NG, B, L*S_g, CS); rows inside a group are (l-major, slot-minor) ---
    xs = x5.reshape(B, L, S, CS)
    xs = jnp.pad(xs, ((0, 0), (0, 0), (0, S_tot - S), (0, 0)))
    xflat = (xs.reshape(B, L, NG, S_g, CS)
               .transpose(2, 0, 1, 3, 4)
               .reshape(NG, B, L * S_g, CS))

    # --- fused per-gate LSTM weights: wg[k] = [W_ih_k ; W_hh_k]^T, torch order i,f,g,o ---
    w_ih, w_hh = params["w_ih"], params["w_hh"]
    b_l = params["b_ih"] + params["b_hh"]
    wg = jnp.stack([jnp.concatenate(
        [w_ih[k * H:(k + 1) * H, :].T, w_hh[k * H:(k + 1) * H, :].T], axis=0)
        for k in range(4)])                                              # (4, CS+H, H)
    bg = jnp.stack([b_l[k * H:(k + 1) * H][None, :] for k in range(4)])  # (4, 1, H)

    # --- regressor layer-1 split: z1 = relu(lstm_last@w1a + (hi@w1b + b1) + r_j*w1c) ---
    w1t = params["w1"].T                       # (2H+1, RH1)
    w1a, w1b, w1c = w1t[:H], w1t[H:2 * H], w1t[2 * H:]
    hi_slot = jnp.repeat(hidden_intensity, MC, axis=1)                   # (B, S, H)
    hi_slot = jnp.pad(hi_slot, ((0, 0), (0, S_tot - S), (0, 0)))
    hig = (hi_slot.reshape(B, NG, S_g, H)
                  .transpose(1, 0, 2, 3)
                  .reshape(NG, B * S_g, H))
    z1pre = jnp.einsum("gbh,hr->gbr", hig, w1b) + params["b1"][None, None, :]

    r_rows = jnp.repeat(r, S_g, axis=0)                                  # (B*S_g, SA)

    w2t, b2 = params["w2"].T, params["b2"][None, :]
    w3t, b3 = params["w3"].T, params["b3"][None, :]
    wfct, bfc = params["wfc"].T, params["bfc"][None, :]

    kernel = functools.partial(_lstm_model_kernel, lookback=L, slots=S_g)
    full = lambda a: pl.BlockSpec(a.shape, lambda g: (0,) * a.ndim)

    out_g = pl.pallas_call(
        kernel,
        grid=(NG,),
        in_specs=[
            pl.BlockSpec((1, B, L * S_g, CS), lambda g: (g, 0, 0, 0)),   # contracts
            pl.BlockSpec((1, B * S_g, RH1), lambda g: (g, 0, 0)),        # z1pre
            full(r_rows),
            full(wg), full(bg), full(w1a), full(w1c),
            full(w2t), full(b2), full(w3t), full(b3), full(wfct), full(bfc),
        ],
        out_specs=pl.BlockSpec((1, B * S_g, SA), lambda g: (g, 0, 0)),
        out_shape=jax.ShapeDtypeStruct((NG, B * S_g, SA), jnp.float32),
        scratch_shapes=[pltpu.VMEM((B * S_g, H), jnp.float32)],
        compiler_params=pltpu.CompilerParams(
            dimension_semantics=("parallel",)),
    )(xflat, z1pre, r_rows, wg, bg, w1a, w1c, w2t, b2, w3t, b3, wfct, bfc)

    # --- mask inactive / padded slots, sum contract slots per node, restore layout ---
    out = (out_g.reshape(NG, B, S_g, SA)
                .transpose(1, 0, 2, 3)
                .reshape(B, S_tot, SA)[:, :S, :])
    out = out * mask[None, :, None]
    return out.reshape(B, N, MC, SA).sum(axis=2)             # (B, N, steps_ahead)


def reference_forward(x, hidden_intensity, r, params, *, contract_size, steps_ahead):
    """Plain-JAX mirror of the PyTorch forward (for a sanity cross-check)."""
    B, L, N, W = x.shape
    CS = contract_size
    MC = W // CS
    H = params["w_hh"].shape[1]
    wih_t, whh_t = params["w_ih"].T, params["w_hh"].T
    bl = params["b_ih"] + params["b_hh"]
    pred = jnp.zeros((B, N, steps_ahead), jnp.float32)
    for n in range(N):
        for i in range(MC):
            contract = x[:, :, n, i * CS:(i + 1) * CS]
            if not bool(jnp.any(contract != 0)):
                break
            for j in range(steps_ahead):
                h = jnp.zeros((L, H), jnp.float32)
                c = jnp.zeros((L, H), jnp.float32)
                outs = []
                for t in range(B):
                    gates = contract[t] @ wih_t + h @ whh_t + bl
                    i_g = jax.nn.sigmoid(gates[:, :H])
                    f_g = jax.nn.sigmoid(gates[:, H:2 * H])
                    g_g = jnp.tanh(gates[:, 2 * H:3 * H])
                    o_g = jax.nn.sigmoid(gates[:, 3 * H:])
                    c = f_g * c + i_g * g_g
                    h = o_g * jnp.tanh(c)
                    outs.append(h[L - 1])
                lstm_last = jnp.stack(outs, axis=0)
                reg_in = jnp.concatenate(
                    [lstm_last, hidden_intensity[:, n, :], r[:, j:j + 1]], axis=1)
                z1 = jax.nn.relu(reg_in @ params["w1"].T + params["b1"])
                z2 = jax.nn.relu(z1 @ params["w2"].T + params["b2"])
                prediction = z2 @ params["w3"].T + params["b3"]
                out_j = jax.nn.relu(prediction) @ params["wfc"].T + params["bfc"]
                pred = pred.at[:, n, j].add(out_j[:, 0])
                contract = jnp.concatenate(
                    [contract[:, 1:, :], prediction[:, None, :]], axis=1)
    return pred


if __name__ == "__main__":
    # args (small, consistent with the module)
    B = 2              # batch (also the LSTM "time" axis, per the PyTorch code)
    L = 4              # lookback (the LSTM "batch" axis)
    N = 3              # num_nodes
    MC = 2             # max_contracts
    CS = 8             # contract_size
    H = 16             # lstm_hidden_size
    RH1, RH2 = 32, 16  # regressor hidden sizes
    SA = 2             # steps_ahead

    key = jax.random.PRNGKey(0)
    keys = jax.random.split(key, 16)

    def u(k, shape, scale):
        return jax.random.uniform(k, shape, jnp.float32, -scale, scale)

    params = dict(
        w_ih=u(keys[0], (4 * H, CS), 1.0 / jnp.sqrt(H)),
        w_hh=u(keys[1], (4 * H, H), 1.0 / jnp.sqrt(H)),
        b_ih=u(keys[2], (4 * H,), 1.0 / jnp.sqrt(H)),
        b_hh=u(keys[3], (4 * H,), 1.0 / jnp.sqrt(H)),
        w1=u(keys[4], (RH1, 2 * H + 1), 1.0 / jnp.sqrt(2 * H + 1)),
        b1=u(keys[5], (RH1,), 1.0 / jnp.sqrt(2 * H + 1)),
        w2=u(keys[6], (RH2, RH1), 1.0 / jnp.sqrt(RH1)),
        b2=u(keys[7], (RH2,), 1.0 / jnp.sqrt(RH1)),
        w3=u(keys[8], (CS, RH2), 1.0 / jnp.sqrt(RH2)),
        b3=u(keys[9], (CS,), 1.0 / jnp.sqrt(RH2)),
        wfc=u(keys[10], (1, CS), 1.0 / jnp.sqrt(CS)),
        bfc=u(keys[11], (1,), 1.0 / jnp.sqrt(CS)),
    )

    x = jax.random.normal(keys[12], (B, L, N, MC * CS), jnp.float32)
    # exercise the "all-zero contract -> break" path
    x = x.at[:, :, 2, CS:2 * CS].set(0.0)   # node 2: second contract slot is empty
    x = x.at[:, :, 1, 0:CS].set(0.0)        # node 1: first slot empty -> whole node skipped
    hidden_intensity = jax.random.normal(keys[13], (B, N, H), jnp.float32)
    r = jax.random.normal(keys[14], (B, SA), jnp.float32)

    pred = lstm_model_forward(x, hidden_intensity, r, params,
                              contract_size=CS, steps_ahead=SA, num_groups=1)
    pred = jax.block_until_ready(pred)

    # v7x-style two-core split over slot groups shares the same kernel code path.
    pred2 = lstm_model_forward(x, hidden_intensity, r, params,
                               contract_size=CS, steps_ahead=SA, num_groups=2)
    pred2 = jax.block_until_ready(pred2)

    ref = reference_forward(x, hidden_intensity, r, params,
                            contract_size=CS, steps_ahead=SA)
    assert pred.shape == (B, N, SA)
    assert jnp.allclose(pred, ref, atol=1e-4, rtol=1e-4), (pred, ref)
    assert jnp.allclose(pred2, ref, atol=1e-4, rtol=1e-4), (pred2, ref)
    print("KERNEL_OK")
</pallas_src>

<mosaic_0001>
module attributes {stable_mosaic.version = 11 : i64} {
  func.func @_lstm_model_kernel(%arg0: i32, %arg1: memref<1x2x32x8xf32, #tpu.memory_space<vmem>>, %arg2: memref<1x16x32xf32, #tpu.memory_space<vmem>>, %arg3: memref<16x2xf32, #tpu.memory_space<vmem>>, %arg4: memref<4x24x16xf32, #tpu.memory_space<vmem>>, %arg5: memref<4x1x16xf32, #tpu.memory_space<vmem>>, %arg6: memref<16x32xf32, #tpu.memory_space<vmem>>, %arg7: memref<1x32xf32, #tpu.memory_space<vmem>>, %arg8: memref<32x16xf32, #tpu.memory_space<vmem>>, %arg9: memref<1x16xf32, #tpu.memory_space<vmem>>, %arg10: memref<16x8xf32, #tpu.memory_space<vmem>>, %arg11: memref<1x8xf32, #tpu.memory_space<vmem>>, %arg12: memref<8x1xf32, #tpu.memory_space<vmem>>, %arg13: memref<1x1xf32, #tpu.memory_space<vmem>>, %arg14: memref<1x16x2xf32, #tpu.memory_space<vmem>>, %arg15: memref<16x16xf32, #tpu.memory_space<vmem>>) attributes {dimension_semantics = [#tpu.dimension_semantics<parallel>], iteration_bounds = array<i64: 1>, scalar_prefetch = 0 : i64, scratch_operands = 1 : i64, tpu.core_type = #tpu.core_type<tc>, window_params = [{transform_indices = @transform_0, window_bounds = array<i64: 1, 2, 32, 8>}, {transform_indices = @transform_1, window_bounds = array<i64: 1, 16, 32>}, {pipeline_mode = #tpu.pipeline_mode<synchronous>, transform_indices = @transform_2, window_bounds = array<i64: 16, 2>}, {pipeline_mode = #tpu.pipeline_mode<synchronous>, transform_indices = @transform_3, window_bounds = array<i64: 4, 24, 16>}, {pipeline_mode = #tpu.pipeline_mode<synchronous>, transform_indices = @transform_4, window_bounds = array<i64: 4, 1, 16>}, {pipeline_mode = #tpu.pipeline_mode<synchronous>, transform_indices = @transform_5, window_bounds = array<i64: 16, 32>}, {pipeline_mode = #tpu.pipeline_mode<synchronous>, transform_indices = @transform_6, window_bounds = array<i64: 1, 32>}, {pipeline_mode = #tpu.pipeline_mode<synchronous>, transform_indices = @transform_7, window_bounds = array<i64: 32, 16>}, {pipeline_mode = #tpu.pipeline_mode<synchronous>, transform_indices = @transform_8, window_bounds = array<i64: 1, 16>}, {pipeline_mode = #tpu.pipeline_mode<synchronous>, transform_indices = @transform_9, window_bounds = array<i64: 16, 8>}, {pipeline_mode = #tpu.pipeline_mode<synchronous>, transform_indices = @transform_10, window_bounds = array<i64: 1, 8>}, {pipeline_mode = #tpu.pipeline_mode<synchronous>, transform_indices = @transform_11, window_bounds = array<i64: 8, 1>}, {pipeline_mode = #tpu.pipeline_mode<synchronous>, transform_indices = @transform_12, window_bounds = array<i64: 1, 1>}, {transform_indices = @transform_13, window_bounds = array<i64: 1, 16, 2>}]} {
    %c0 = arith.constant 0 : index
    %c0_0 = arith.constant 0 : index
    %c0_1 = arith.constant 0 : index
    %0 = vector.load %arg4[%c0, %c0_0, %c0_1] : memref<4x24x16xf32, #tpu.memory_space<vmem>>, vector<1x24x16xf32>
    %1 = vector.shape_cast %0 : vector<1x24x16xf32> to vector<24x16xf32>
    %c1 = arith.constant 1 : index
    %c0_2 = arith.constant 0 : index
    %c0_3 = arith.constant 0 : index
    %2 = vector.load %arg4[%c1, %c0_2, %c0_3] : memref<4x24x16xf32, #tpu.memory_space<vmem>>, vector<1x24x16xf32>
    %3 = vector.shape_cast %2 : vector<1x24x16xf32> to vector<24x16xf32>
    %c2 = arith.constant 2 : index
    %c0_4 = arith.constant 0 : index
    %c0_5 = arith.constant 0 : index
    %4 = vector.load %arg4[%c2, %c0_4, %c0_5] : memref<4x24x16xf32, #tpu.memory_space<vmem>>, vector<1x24x16xf32>
    %5 = vector.shape_cast %4 : vector<1x24x16xf32> to vector<24x16xf32>
    %c3 = arith.constant 3 : index
    %c0_6 = arith.constant 0 : index
    %c0_7 = arith.constant 0 : index
    %6 = vector.load %arg4[%c3, %c0_6, %c0_7] : memref<4x24x16xf32, #tpu.memory_space<vmem>>, vector<1x24x16xf32>
    %7 = vector.shape_cast %6 : vector<1x24x16xf32> to vector<24x16xf32>
    %c0_8 = arith.constant 0 : index
    %c0_9 = arith.constant 0 : index
    %c0_10 = arith.constant 0 : index
    %8 = vector.load %arg5[%c0_8, %c0_9, %c0_10] : memref<4x1x16xf32, #tpu.memory_space<vmem>>, vector<1x1x16xf32>
    %9 = vector.shape_cast %8 : vector<1x1x16xf32> to vector<1x16xf32>
    %c1_11 = arith.constant 1 : index
    %c0_12 = arith.constant 0 : index
    %c0_13 = arith.constant 0 : index
    %10 = vector.load %arg5[%c1_11, %c0_12, %c0_13] : memref<4x1x16xf32, #tpu.memory_space<vmem>>, vector<1x1x16xf32>
    %11 = vector.shape_cast %10 : vector<1x1x16xf32> to vector<1x16xf32>
    %c2_14 = arith.constant 2 : index
    %c0_15 = arith.constant 0 : index
    %c0_16 = arith.constant 0 : index
    %12 = vector.load %arg5[%c2_14, %c0_15, %c0_16] : memref<4x1x16xf32, #tpu.memory_space<vmem>>, vector<1x1x16xf32>
    %13 = vector.shape_cast %12 : vector<1x1x16xf32> to vector<1x16xf32>
    %c3_17 = arith.constant 3 : index
    %c0_18 = arith.constant 0 : index
    %c0_19 = arith.constant 0 : index
    %14 = vector.load %arg5[%c3_17, %c0_18, %c0_19] : memref<4x1x16xf32, #tpu.memory_space<vmem>>, vector<1x1x16xf32>
    %15 = vector.shape_cast %14 : vector<1x1x16xf32> to vector<1x16xf32>
    %c0_20 = arith.constant 0 : index
    %c0_21 = arith.constant 0 : index
    %16 = vector.load %arg6[%c0_20, %c0_21] : memref<16x32xf32, #tpu.memory_space<vmem>>, vector<16x32xf32>
    %c0_22 = arith.constant 0 : index
    %c0_23 = arith.constant 0 : index
    %17 = vector.load %arg7[%c0_22, %c0_23] : memref<1x32xf32, #tpu.memory_space<vmem>>, vector<1x32xf32>
    %c0_24 = arith.constant 0 : index
    %c0_25 = arith.constant 0 : index
    %18 = vector.load %arg8[%c0_24, %c0_25] : memref<32x16xf32, #tpu.memory_space<vmem>>, vector<32x16xf32>
    %c0_26 = arith.constant 0 : index
    %c0_27 = arith.constant 0 : index
    %19 = vector.load %arg9[%c0_26, %c0_27] : memref<1x16xf32, #tpu.memory_space<vmem>>, vector<1x16xf32>
    %c0_28 = arith.constant 0 : index
    %c0_29 = arith.constant 0 : index
    %20 = vector.load %arg10[%c0_28, %c0_29] : memref<16x8xf32, #tpu.memory_space<vmem>>, vector<16x8xf32>
    %c0_30 = arith.constant 0 : index
    %c0_31 = arith.constant 0 : index
    %21 = vector.load %arg11[%c0_30, %c0_31] : memref<1x8xf32, #tpu.memory_space<vmem>>, vector<1x8xf32>
    %c0_32 = arith.constant 0 : index
    %c0_33 = arith.constant 0 : index
    %22 = vector.load %arg12[%c0_32, %c0_33] : memref<8x1xf32, #tpu.memory_space<vmem>>, vector<8x1xf32>
    %c0_34 = arith.constant 0 : index
    %c0_35 = arith.constant 0 : index
    %23 = vector.load %arg13[%c0_34, %c0_35] : memref<1x1xf32, #tpu.memory_space<vmem>>, vector<1x1xf32>
    %c0_36 = arith.constant 0 : index
    %c0_37 = arith.constant 0 : index
    %c0_38 = arith.constant 0 : index
    %24 = vector.load %arg2[%c0_36, %c0_37, %c0_38] : memref<1x16x32xf32, #tpu.memory_space<vmem>>, vector<1x16x32xf32>
    %25 = vector.shape_cast %24 : vector<1x16x32xf32> to vector<16x32xf32>
    %c0_39 = arith.constant 0 : index
    %c0_40 = arith.constant 0 : index
    %c0_41 = arith.constant 0 : index
    %c0_42 = arith.constant 0 : index
    %26 = vector.load %arg1[%c0_39, %c0_40, %c0_41, %c0_42] : memref<1x2x32x8xf32, #tpu.memory_space<vmem>>, vector<1x2x32x8xf32>
    %27 = vector.shape_cast %26 : vector<1x2x32x8xf32> to vector<2x32x8xf32>
    %cst = arith.constant 0.000000e+00 : f32
    %28 = vector.broadcast %cst : f32 to vector<32x16xf32>
    %cst_43 = arith.constant 0.000000e+00 : f32
    %29 = vector.broadcast %cst_43 : f32 to vector<32x16xf32>
    %30 = vector.extract_strided_slice %27 {offsets = [0, 0, 0], sizes = [1, 32, 8], strides = [1, 1, 1]} : vector<2x32x8xf32> to vector<1x32x8xf32>
    %31 = vector.shape_cast %30 : vector<1x32x8xf32> to vector<32x8xf32>
    %32 = tpu.concatenate %31, %28 in 1 : vector<32x8xf32>, vector<32x16xf32> -> vector<32x24xf32>
    %cst_44 = arith.constant dense<0.000000e+00> : vector<32x16xf32>
    %33 = tpu.matmul %32, %1, %cst_44 {dimension_numbers = #tpu.dot_dimension_numbers<[1], [0], [0], [1], [0, 0, 1, 1], [], []>} : vector<32x24xf32>, vector<24x16xf32>, vector<32x16xf32> -> vector<32x16xf32>
    %34 = vector.broadcast %9 : vector<1x16xf32> to vector<32x16xf32>
    %35 = arith.addf %33, %34 : vector<32x16xf32>
    %36 = arith.negf %35 : vector<32x16xf32>
    %37 = math.exp %36 : vector<32x16xf32>
    %cst_45 = arith.constant 1.000000e+00 : f32
    %38 = vector.broadcast %cst_45 : f32 to vector<32x16xf32>
    %39 = arith.addf %38, %37 : vector<32x16xf32>
    %40 = arith.divf %38, %39 : vector<32x16xf32>
    %cst_46 = arith.constant dense<0.000000e+00> : vector<32x16xf32>
    %41 = tpu.matmul %32, %3, %cst_46 {dimension_numbers = #tpu.dot_dimension_numbers<[1], [0], [0], [1], [0, 0, 1, 1], [], []>} : vector<32x24xf32>, vector<24x16xf32>, vector<32x16xf32> -> vector<32x16xf32>
    %42 = vector.broadcast %11 : vector<1x16xf32> to vector<32x16xf32>
    %43 = arith.addf %41, %42 : vector<32x16xf32>
    %44 = arith.negf %43 : vector<32x16xf32>
    %45 = math.exp %44 : vector<32x16xf32>
    %cst_47 = arith.constant 1.000000e+00 : f32
    %46 = vector.broadcast %cst_47 : f32 to vector<32x16xf32>
    %47 = arith.addf %46, %45 : vector<32x16xf32>
    %48 = arith.divf %46, %47 : vector<32x16xf32>
    %cst_48 = arith.constant dense<0.000000e+00> : vector<32x16xf32>
    %49 = tpu.matmul %32, %5, %cst_48 {dimension_numbers = #tpu.dot_dimension_numbers<[1], [0], [0], [1], [0, 0, 1, 1], [], []>} : vector<32x24xf32>, vector<24x16xf32>, vector<32x16xf32> -> vector<32x16xf32>
    %50 = vector.broadcast %13 : vector<1x16xf32> to vector<32x16xf32>
    %51 = arith.addf %49, %50 : vector<32x16xf32>
    %52 = math.tanh %51 : vector<32x16xf32>
    %cst_49 = arith.constant dense<0.000000e+00> : vector<32x16xf32>
    %53 = tpu.matmul %32, %7, %cst_49 {dimension_numbers = #tpu.dot_dimension_numbers<[1], [0], [0], [1], [0, 0, 1, 1], [], []>} : vector<32x24xf32>, vector<24x16xf32>, vector<32x16xf32> -> vector<32x16xf32>
    %54 = vector.broadcast %15 : vector<1x16xf32> to vector<32x16xf32>
    %55 = arith.addf %53, %54 : vector<32x16xf32>
    %56 = arith.negf %55 : vector<32x16xf32>
    %57 = math.exp %56 : vector<32x16xf32>
    %cst_50 = arith.constant 1.000000e+00 : f32
    %58 = vector.broadcast %cst_50 : f32 to vector<32x16xf32>
    %59 = arith.addf %58, %57 : vector<32x16xf32>
    %60 = arith.divf %58, %59 : vector<32x16xf32>
    %61 = arith.mulf %48, %29 : vector<32x16xf32>
    %62 = arith.mulf %40, %52 : vector<32x16xf32>
    %63 = arith.addf %61, %62 : vector<32x16xf32>
    %64 = math.tanh %63 : vector<32x16xf32>
    %65 = arith.mulf %60, %64 : vector<32x16xf32>
    %66 = vector.extract_strided_slice %65 {offsets = [24, 0], sizes = [8, 16], strides = [1, 1]} : vector<32x16xf32> to vector<8x16xf32>
    %c0_51 = arith.constant 0 : index
    %c0_52 = arith.constant 0 : index
    %67 = vector.load %arg15[%c0_51, %c0_52] : memref<16x16xf32, #tpu.memory_space<vmem>>, vector<8x16xf32>
    tpu.vector_store %arg15[%c0_51, %c0_52], %66 {strides = array<i32>} : memref<16x16xf32, #tpu.memory_space<vmem>>, vector<8x16xf32>,
    %68 = vector.extract_strided_slice %27 {offsets = [1, 0, 0], sizes = [1, 32, 8], strides = [1, 1, 1]} : vector<2x32x8xf32> to vector<1x32x8xf32>
    %69 = vector.shape_cast %68 : vector<1x32x8xf32> to vector<32x8xf32>
    %70 = tpu.concatenate %69, %65 in 1 : vector<32x8xf32>, vector<32x16xf32> -> vector<32x24xf32>
    %cst_53 = arith.constant dense<0.000000e+00> : vector<32x16xf32>
    %71 = tpu.matmul %70, %1, %cst_53 {dimension_numbers = #tpu.dot_dimension_numbers<[1], [0], [0], [1], [0, 0, 1, 1], [], []>} : vector<32x24xf32>, vector<24x16xf32>, vector<32x16xf32> -> vector<32x16xf32>
    %72 = vector.broadcast %9 : vector<1x16xf32> to vector<32x16xf32>
    %73 = arith.addf %71, %72 : vector<32x16xf32>
    %74 = arith.negf %73 : vector<32x16xf32>
    %75 = math.exp %74 : vector<32x16xf32>
    %cst_54 = arith.constant 1.000000e+00 : f32
    %76 = vector.broadcast %cst_54 : f32 to vector<32x16xf32>
    %77 = arith.addf %76, %75 : vector<32x16xf32>
    %78 = arith.divf %76, %77 : vector<32x16xf32>
    %cst_55 = arith.constant dense<0.000000e+00> : vector<32x16xf32>
    %79 = tpu.matmul %70, %3, %cst_55 {dimension_numbers = #tpu.dot_dimension_numbers<[1], [0], [0], [1], [0, 0, 1, 1], [], []>} : vector<32x24xf32>, vector<24x16xf32>, vector<32x16xf32> -> vector<32x16xf32>
    %80 = vector.broadcast %11 : vector<1x16xf32> to vector<32x16xf32>
    %81 = arith.addf %79, %80 : vector<32x16xf32>
    %82 = arith.negf %81 : vector<32x16xf32>
    %83 = math.exp %82 : vector<32x16xf32>
    %cst_56 = arith.constant 1.000000e+00 : f32
    %84 = vector.broadcast %cst_56 : f32 to vector<32x16xf32>
    %85 = arith.addf %84, %83 : vector<32x16xf32>
    %86 = arith.divf %84, %85 : vector<32x16xf32>
    %cst_57 = arith.constant dense<0.000000e+00> : vector<32x16xf32>
    %87 = tpu.matmul %70, %5, %cst_57 {dimension_numbers = #tpu.dot_dimension_numbers<[1], [0], [0], [1], [0, 0, 1, 1], [], []>} : vector<32x24xf32>, vector<24x16xf32>, vector<32x16xf32> -> vector<32x16xf32>
    %88 = vector.broadcast %13 : vector<1x16xf32> to vector<32x16xf32>
    %89 = arith.addf %87, %88 : vector<32x16xf32>
    %90 = math.tanh %89 : vector<32x16xf32>
    %cst_58 = arith.constant dense<0.000000e+00> : vector<32x16xf32>
    %91 = tpu.matmul %70, %7, %cst_58 {dimension_numbers = #tpu.dot_dimension_numbers<[1], [0], [0], [1], [0, 0, 1, 1], [], []>} : vector<32x24xf32>, vector<24x16xf32>, vector<32x16xf32> -> vector<32x16xf32>
    %92 = vector.broadcast %15 : vector<1x16xf32> to vector<32x16xf32>
    %93 = arith.addf %91, %92 : vector<32x16xf32>
    %94 = arith.negf %93 : vector<32x16xf32>
    %95 = math.exp %94 : vector<32x16xf32>
    %cst_59 = arith.constant 1.000000e+00 : f32
    %96 = vector.broadcast %cst_59 : f32 to vector<32x16xf32>
    %97 = arith.addf %96, %95 : vector<32x16xf32>
    %98 = arith.divf %96, %97 : vector<32x16xf32>
    %99 = arith.mulf %86, %63 : vector<32x16xf32>
    %100 = arith.mulf %78, %90 : vector<32x16xf32>
    %101 = arith.addf %99, %100 : vector<32x16xf32>
    %102 = math.tanh %101 : vector<32x16xf32>
    %103 = arith.mulf %98, %102 : vector<32x16xf32>
    %104 = vector.extract_strided_slice %103 {offsets = [24, 0], sizes = [8, 16], strides = [1, 1]} : vector<32x16xf32> to vector<8x16xf32>
    %c8 = arith.constant 8 : index
    %c0_60 = arith.constant 0 : index
    %105 = vector.load %arg15[%c8, %c0_60] : memref<16x16xf32, #tpu.memory_space<vmem>>, vector<8x16xf32>
    tpu.vector_store %arg15[%c8, %c0_60], %104 {strides = array<i32>} : memref<16x16xf32, #tpu.memory_space<vmem>>, vector<8x16xf32>,
    %c0_61 = arith.constant 0 : index
    %c0_62 = arith.constant 0 : index
    %106 = vector.load %arg15[%c0_61, %c0_62] : memref<16x16xf32, #tpu.memory_space<vmem>>, vector<16x16xf32>
    %c0_63 = arith.constant 0 : index
    %c0_64 = arith.constant 0 : index
    %107 = vector.load %arg3[%c0_63, %c0_64] : memref<16x2xf32, #tpu.memory_space<vmem>>, vector<16x1xf32>
    %cst_65 = arith.constant dense<0.000000e+00> : vector<16x32xf32>
    %108 = tpu.matmul %106, %16, %cst_65 {dimension_numbers = #tpu.dot_dimension_numbers<[1], [0], [0], [1], [0, 0, 1, 1], [], []>} : vector<16x16xf32>, vector<16x32xf32>, vector<16x32xf32> -> vector<16x32xf32>
    %109 = arith.addf %108, %25 : vector<16x32xf32>
    %110 = vector.broadcast %107 : vector<16x1xf32> to vector<16x32xf32>
    %111 = vector.broadcast %17 : vector<1x32xf32> to vector<16x32xf32>
    %112 = arith.mulf %110, %111 : vector<16x32xf32>
    %113 = arith.addf %109, %112 : vector<16x32xf32>
    %cst_66 = arith.constant 0.000000e+00 : f32
    %114 = vector.broadcast %cst_66 : f32 to vector<16x32xf32>
    %115 = arith.maximumf %113, %114 : vector<16x32xf32>
    %cst_67 = arith.constant dense<0.000000e+00> : vector<16x16xf32>
    %116 = tpu.matmul %115, %18, %cst_67 {dimension_numbers = #tpu.dot_dimension_numbers<[1], [0], [0], [1], [0, 0, 1, 1], [], []>} : vector<16x32xf32>, vector<32x16xf32>, vector<16x16xf32> -> vector<16x16xf32>
    %117 = vector.broadcast %19 : vector<1x16xf32> to vector<16x16xf32>
    %118 = arith.addf %116, %117 : vector<16x16xf32>
    %cst_68 = arith.constant 0.000000e+00 : f32
    %119 = vector.broadcast %cst_68 : f32 to vector<16x16xf32>
    %120 = arith.maximumf %118, %119 : vector<16x16xf32>
    %cst_69 = arith.constant dense<0.000000e+00> : vector<16x8xf32>
    %121 = tpu.matmul %120, %20, %cst_69 {dimension_numbers = #tpu.dot_dimension_numbers<[1], [0], [0], [1], [0, 0, 1, 1], [], []>} : vector<16x16xf32>, vector<16x8xf32>, vector<16x8xf32> -> vector<16x8xf32>
    %122 = vector.broadcast %21 : vector<1x8xf32> to vector<16x8xf32>
    %123 = arith.addf %121, %122 : vector<16x8xf32>
    %cst_70 = arith.constant 0.000000e+00 : f32
    %124 = vector.broadcast %cst_70 : f32 to vector<16x8xf32>
    %125 = arith.maximumf %123, %124 : vector<16x8xf32>
    %cst_71 = arith.constant dense<0.000000e+00> : vector<16x1xf32>
    %126 = tpu.matmul %125, %22, %cst_71 {dimension_numbers = #tpu.dot_dimension_numbers<[1], [0], [0], [1], [0, 0, 1, 1], [], []>} : vector<16x8xf32>, vector<8x1xf32>, vector<16x1xf32> -> vector<16x1xf32>
    %127 = vector.broadcast %23 : vector<1x1xf32> to vector<16x1xf32>
    %128 = arith.addf %126, %127 : vector<16x1xf32>
    %129 = vector.shape_cast %123 : vector<16x8xf32> to vector<2x8x8xf32>
    %130 = vector.extract_strided_slice %27 {offsets = [0, 8, 0], sizes = [2, 24, 8], strides = [1, 1, 1]} : vector<2x32x8xf32> to vector<2x24x8xf32>
    %131 = tpu.concatenate %130, %129 in 1 : vector<2x24x8xf32>, vector<2x8x8xf32> -> vector<2x32x8xf32>
    %cst_72 = arith.constant 0.000000e+00 : f32
    %132 = vector.broadcast %cst_72 : f32 to vector<32x16xf32>
    %cst_73 = arith.constant 0.000000e+00 : f32
    %133 = vector.broadcast %cst_73 : f32 to vector<32x16xf32>
    %134 = vector.extract_strided_slice %131 {offsets = [0, 0, 0], sizes = [1, 32, 8], strides = [1, 1, 1]} : vector<2x32x8xf32> to vector<1x32x8xf32>
    %135 = vector.shape_cast %134 : vector<1x32x8xf32> to vector<32x8xf32>
    %136 = tpu.concatenate %135, %132 in 1 : vector<32x8xf32>, vector<32x16xf32> -> vector<32x24xf32>
    %cst_74 = arith.constant dense<0.000000e+00> : vector<32x16xf32>
    %137 = tpu.matmul %136, %1, %cst_74 {dimension_numbers = #tpu.dot_dimension_numbers<[1], [0], [0], [1], [0, 0, 1, 1], [], []>} : vector<32x24xf32>, vector<24x16xf32>, vector<32x16xf32> -> vector<32x16xf32>
    %138 = vector.broadcast %9 : vector<1x16xf32> to vector<32x16xf32>
    %139 = arith.addf %137, %138 : vector<32x16xf32>
    %140 = arith.negf %139 : vector<32x16xf32>
    %141 = math.exp %140 : vector<32x16xf32>
    %cst_75 = arith.constant 1.000000e+00 : f32
    %142 = vector.broadcast %cst_75 : f32 to vector<32x16xf32>
    %143 = arith.addf %142, %141 : vector<32x16xf32>
    %144 = arith.divf %142, %143 : vector<32x16xf32>
    %cst_76 = arith.constant dense<0.000000e+00> : vector<32x16xf32>
    %145 = tpu.matmul %136, %3, %cst_76 {dimension_numbers = #tpu.dot_dimension_numbers<[1], [0], [0], [1], [0, 0, 1, 1], [], []>} : vector<32x24xf32>, vector<24x16xf32>, vector<32x16xf32> -> vector<32x16xf32>
    %146 = vector.broadcast %11 : vector<1x16xf32> to vector<32x16xf32>
    %147 = arith.addf %145, %146 : vector<32x16xf32>
    %148 = arith.negf %147 : vector<32x16xf32>
    %149 = math.exp %148 : vector<32x16xf32>
    %cst_77 = arith.constant 1.000000e+00 : f32
    %150 = vector.broadcast %cst_77 : f32 to vector<32x16xf32>
    %151 = arith.addf %150, %149 : vector<32x16xf32>
    %152 = arith.divf %150, %151 : vector<32x16xf32>
    %cst_78 = arith.constant dense<0.000000e+00> : vector<32x16xf32>
    %153 = tpu.matmul %136, %5, %cst_78 {dimension_numbers = #tpu.dot_dimension_numbers<[1], [0], [0], [1], [0, 0, 1, 1], [], []>} : vector<32x24xf32>, vector<24x16xf32>, vector<32x16xf32> -> vector<32x16xf32>
    %154 = vector.broadcast %13 : vector<1x16xf32> to vector<32x16xf32>
    %155 = arith.addf %153, %154 : vector<32x16xf32>
    %156 = math.tanh %155 : vector<32x16xf32>
    %cst_79 = arith.constant dense<0.000000e+00> : vector<32x16xf32>
    %157 = tpu.matmul %136, %7, %cst_79 {dimension_numbers = #tpu.dot_dimension_numbers<[1], [0], [0], [1], [0, 0, 1, 1], [], []>} : vector<32x24xf32>, vector<24x16xf32>, vector<32x16xf32> -> vector<32x16xf32>
    %158 = vector.broadcast %15 : vector<1x16xf32> to vector<32x16xf32>
    %159 = arith.addf %157, %158 : vector<32x16xf32>
    %160 = arith.negf %159 : vector<32x16xf32>
    %161 = math.exp %160 : vector<32x16xf32>
    %cst_80 = arith.constant 1.000000e+00 : f32
    %162 = vector.broadcast %cst_80 : f32 to vector<32x16xf32>
    %163 = arith.addf %162, %161 : vector<32x16xf32>
    %164 = arith.divf %162, %163 : vector<32x16xf32>
    %165 = arith.mulf %152, %133 : vector<32x16xf32>
    %166 = arith.mulf %144, %156 : vector<32x16xf32>
    %167 = arith.addf %165, %166 : vector<32x16xf32>
    %168 = math.tanh %167 : vector<32x16xf32>
    %169 = arith.mulf %164, %168 : vector<32x16xf32>
    %170 = vector.extract_strided_slice %169 {offsets = [24, 0], sizes = [8, 16], strides = [1, 1]} : vector<32x16xf32> to vector<8x16xf32>
    %c0_81 = arith.constant 0 : index
    %c0_82 = arith.constant 0 : index
    %171 = vector.load %arg15[%c0_81, %c0_82] : memref<16x16xf32, #tpu.memory_space<vmem>>, vector<8x16xf32>
    tpu.vector_store %arg15[%c0_81, %c0_82], %170 {strides = array<i32>} : memref<16x16xf32, #tpu.memory_space<vmem>>, vector<8x16xf32>,
    %172 = vector.extract_strided_slice %131 {offsets = [1, 0, 0], sizes = [1, 32, 8], strides = [1, 1, 1]} : vector<2x32x8xf32> to vector<1x32x8xf32>
    %173 = vector.shape_cast %172 : vector<1x32x8xf32> to vector<32x8xf32>
    %174 = tpu.concatenate %173, %169 in 1 : vector<32x8xf32>, vector<32x16xf32> -> vector<32x24xf32>
    %cst_83 = arith.constant dense<0.000000e+00> : vector<32x16xf32>
    %175 = tpu.matmul %174, %1, %cst_83 {dimension_numbers = #tpu.dot_dimension_numbers<[1], [0], [0], [1], [0, 0, 1, 1], [], []>} : vector<32x24xf32>, vector<24x16xf32>, vector<32x16xf32> -> vector<32x16xf32>
    %176 = vector.broadcast %9 : vector<1x16xf32> to vector<32x16xf32>
    %177 = arith.addf %175, %176 : vector<32x16xf32>
    %178 = arith.negf %177 : vector<32x16xf32>
    %179 = math.exp %178 : vector<32x16xf32>
    %cst_84 = arith.constant 1.000000e+00 : f32
    %180 = vector.broadcast %cst_84 : f32 to vector<32x16xf32>
    %181 = arith.addf %180, %179 : vector<32x16xf32>
    %182 = arith.divf %180, %181 : vector<32x16xf32>
    %cst_85 = arith.constant dense<0.000000e+00> : vector<32x16xf32>
    %183 = tpu.matmul %174, %3, %cst_85 {dimension_numbers = #tpu.dot_dimension_numbers<[1], [0], [0], [1], [0, 0, 1, 1], [], []>} : vector<32x24xf32>, vector<24x16xf32>, vector<32x16xf32> -> vector<32x16xf32>
    %184 = vector.broadcast %11 : vector<1x16xf32> to vector<32x16xf32>
    %185 = arith.addf %183, %184 : vector<32x16xf32>
    %186 = arith.negf %185 : vector<32x16xf32>
    %187 = math.exp %186 : vector<32x16xf32>
    %cst_86 = arith.constant 1.000000e+00 : f32
    %188 = vector.broadcast %cst_86 : f32 to vector<32x16xf32>
    %189 = arith.addf %188, %187 : vector<32x16xf32>
    %190 = arith.divf %188, %189 : vector<32x16xf32>
    %cst_87 = arith.constant dense<0.000000e+00> : vector<32x16xf32>
    %191 = tpu.matmul %174, %5, %cst_87 {dimension_numbers = #tpu.dot_dimension_numbers<[1], [0], [0], [1], [0, 0, 1, 1], [], []>} : vector<32x24xf32>, vector<24x16xf32>, vector<32x16xf32> -> vector<32x16xf32>
    %192 = vector.broadcast %13 : vector<1x16xf32> to vector<32x16xf32>
    %193 = arith.addf %191, %192 : vector<32x16xf32>
    %194 = math.tanh %193 : vector<32x16xf32>
    %cst_88 = arith.constant dense<0.000000e+00> : vector<32x16xf32>
    %195 = tpu.matmul %174, %7, %cst_88 {dimension_numbers = #tpu.dot_dimension_numbers<[1], [0], [0], [1], [0, 0, 1, 1], [], []>} : vector<32x24xf32>, vector<24x16xf32>, vector<32x16xf32> -> vector<32x16xf32>
    %196 = vector.broadcast %15 : vector<1x16xf32> to vector<32x16xf32>
    %197 = arith.addf %195, %196 : vector<32x16xf32>
    %198 = arith.negf %197 : vector<32x16xf32>
    %199 = math.exp %198 : vector<32x16xf32>
    %cst_89 = arith.constant 1.000000e+00 : f32
    %200 = vector.broadcast %cst_89 : f32 to vector<32x16xf32>
    %201 = arith.addf %200, %199 : vector<32x16xf32>
    %202 = arith.divf %200, %201 : vector<32x16xf32>
    %203 = arith.mulf %190, %167 : vector<32x16xf32>
    %204 = arith.mulf %182, %194 : vector<32x16xf32>
    %205 = arith.addf %203, %204 : vector<32x16xf32>
    %206 = math.tanh %205 : vector<32x16xf32>
    %207 = arith.mulf %202, %206 : vector<32x16xf32>
    %208 = vector.extract_strided_slice %207 {offsets = [24, 0], sizes = [8, 16], strides = [1, 1]} : vector<32x16xf32> to vector<8x16xf32>
    %c8_90 = arith.constant 8 : index
    %c0_91 = arith.constant 0 : index
    %209 = vector.load %arg15[%c8_90, %c0_91] : memref<16x16xf32, #tpu.memory_space<vmem>>, vector<8x16xf32>
    tpu.vector_store %arg15[%c8_90, %c0_91], %208 {strides = array<i32>} : memref<16x16xf32, #tpu.memory_space<vmem>>, vector<8x16xf32>,
    %c0_92 = arith.constant 0 : index
    %c0_93 = arith.constant 0 : index
    %210 = vector.load %arg15[%c0_92, %c0_93] : memref<16x16xf32, #tpu.memory_space<vmem>>, vector<16x16xf32>
    %c0_94 = arith.constant 0 : index
    %c1_95 = arith.constant 1 : index
    %211 = vector.load %arg3[%c0_94, %c1_95] : memref<16x2xf32, #tpu.memory_space<vmem>>, vector<16x1xf32>
    %cst_96 = arith.constant dense<0.000000e+00> : vector<16x32xf32>
    %212 = tpu.matmul %210, %16, %cst_96 {dimension_numbers = #tpu.dot_dimension_numbers<[1], [0], [0], [1], [0, 0, 1, 1], [], []>} : vector<16x16xf32>, vector<16x32xf32>, vector<16x32xf32> -> vector<16x32xf32>
    %213 = arith.addf %212, %25 : vector<16x32xf32>
    %214 = vector.broadcast %211 : vector<16x1xf32> to vector<16x32xf32>
    %215 = vector.broadcast %17 : vector<1x32xf32> to vector<16x32xf32>
    %216 = arith.mulf %214, %215 : vector<16x32xf32>
    %217 = arith.addf %213, %216 : vector<16x32xf32>
    %cst_97 = arith.constant 0.000000e+00 : f32
    %218 = vector.broadcast %cst_97 : f32 to vector<16x32xf32>
    %219 = arith.maximumf %217, %218 : vector<16x32xf32>
    %cst_98 = arith.constant dense<0.000000e+00> : vector<16x16xf32>
    %220 = tpu.matmul %219, %18, %cst_98 {dimension_numbers = #tpu.dot_dimension_numbers<[1], [0], [0], [1], [0, 0, 1, 1], [], []>} : vector<16x32xf32>, vector<32x16xf32>, vector<16x16xf32> -> vector<16x16xf32>
    %221 = vector.broadcast %19 : vector<1x16xf32> to vector<16x16xf32>
    %222 = arith.addf %220, %221 : vector<16x16xf32>
    %cst_99 = arith.constant 0.000000e+00 : f32
    %223 = vector.broadcast %cst_99 : f32 to vector<16x16xf32>
    %224 = arith.maximumf %222, %223 : vector<16x16xf32>
    %cst_100 = arith.constant dense<0.000000e+00> : vector<16x8xf32>
    %225 = tpu.matmul %224, %20, %cst_100 {dimension_numbers = #tpu.dot_dimension_numbers<[1], [0], [0], [1], [0, 0, 1, 1], [], []>} : vector<16x16xf32>, vector<16x8xf32>, vector<16x8xf32> -> vector<16x8xf32>
    %226 = vector.broadcast %21 : vector<1x8xf32> to vector<16x8xf32>
    %227 = arith.addf %225, %226 : vector<16x8xf32>
    %cst_101 = arith.constant 0.000000e+00 : f32
    %228 = vector.broadcast %cst_101 : f32 to vector<16x8xf32>
    %229 = arith.maximumf %227, %228 : vector<16x8xf32>
    %cst_102 = arith.constant dense<0.000000e+00> : vector<16x1xf32>
    %230 = tpu.matmul %229, %22, %cst_102 {dimension_numbers = #tpu.dot_dimension_numbers<[1], [0], [0], [1], [0, 0, 1, 1], [], []>} : vector<16x8xf32>, vector<8x1xf32>, vector<16x1xf32> -> vector<16x1xf32>
    %231 = vector.broadcast %23 : vector<1x1xf32> to vector<16x1xf32>
    %232 = arith.addf %230, %231 : vector<16x1xf32>
    %233 = tpu.concatenate %128, %232 in 1 : vector<16x1xf32>, vector<16x1xf32> -> vector<16x2xf32>
    %c0_103 = arith.constant 0 : index
    %c0_104 = arith.constant 0 : index
    %c0_105 = arith.constant 0 : index
    %234 = vector.load %arg14[%c0_103, %c0_104, %c0_105] : memref<1x16x2xf32, #tpu.memory_space<vmem>>, vector<1x16x2xf32>
    %235 = vector.shape_cast %234 : vector<1x16x2xf32> to vector<16x2xf32>
    %236 = vector.shape_cast %233 : vector<16x2xf32> to vector<1x16x2xf32>
    tpu.vector_store %arg14[%c0_103, %c0_104, %c0_105], %236 {strides = array<i32>} : memref<1x16x2xf32, #tpu.memory_space<vmem>>, vector<1x16x2xf32>,
    return
  }
  func.func @transform_0(%arg0: i32) -> (i32, i32, i32, i32) {
    %c0_i32 = arith.constant 0 : i32
    %c0_i32_0 = arith.constant 0 : i32
    %c0_i32_1 = arith.constant 0 : i32
    %c0_i32_2 = arith.constant 0 : i32
    return %arg0, %c0_i32, %c0_i32_0, %c0_i32_1 : i32, i32, i32, i32
  }
  func.func @transform_1(%arg0: i32) -> (i32, i32, i32) {
    %c0_i32 = arith.constant 0 : i32
    %c0_i32_0 = arith.constant 0 : i32
    %c0_i32_1 = arith.constant 0 : i32
    return %arg0, %c0_i32, %c0_i32_0 : i32, i32, i32
  }
  func.func @transform_2(%arg0: i32) -> (i32, i32) {
    %c0_i32 = arith.constant 0 : i32
    %c0_i32_0 = arith.constant 0 : i32
    %c0_i32_1 = arith.constant 0 : i32
    return %c0_i32, %c0_i32_0 : i32, i32
  }
  func.func @transform_3(%arg0: i32) -> (i32, i32, i32) {
    %c0_i32 = arith.constant 0 : i32
    %c0_i32_0 = arith.constant 0 : i32
    %c0_i32_1 = arith.constant 0 : i32
    %c0_i32_2 = arith.constant 0 : i32
    return %c0_i32, %c0_i32_0, %c0_i32_1 : i32, i32, i32
  }
  func.func @transform_4(%arg0: i32) -> (i32, i32, i32) {
    %c0_i32 = arith.constant 0 : i32
    %c0_i32_0 = arith.constant 0 : i32
    %c0_i32_1 = arith.constant 0 : i32
    %c0_i32_2 = arith.constant 0 : i32
    return %c0_i32, %c0_i32_0, %c0_i32_1 : i32, i32, i32
  }
  func.func @transform_5(%arg0: i32) -> (i32, i32) {
    %c0_i32 = arith.constant 0 : i32
    %c0_i32_0 = arith.constant 0 : i32
    %c0_i32_1 = arith.constant 0 : i32
    return %c0_i32, %c0_i32_0 : i32, i32
  }
  func.func @transform_6(%arg0: i32) -> (i32, i32) {
    %c0_i32 = arith.constant 0 : i32
    %c0_i32_0 = arith.constant 0 : i32
    %c0_i32_1 = arith.constant 0 : i32
    return %c0_i32, %c0_i32_0 : i32, i32
  }
  func.func @transform_7(%arg0: i32) -> (i32, i32) {
    %c0_i32 = arith.constant 0 : i32
    %c0_i32_0 = arith.constant 0 : i32
    %c0_i32_1 = arith.constant 0 : i32
    return %c0_i32, %c0_i32_0 : i32, i32
  }
  func.func @transform_8(%arg0: i32) -> (i32, i32) {
    %c0_i32 = arith.constant 0 : i32
    %c0_i32_0 = arith.constant 0 : i32
    %c0_i32_1 = arith.constant 0 : i32
    return %c0_i32, %c0_i32_0 : i32, i32
  }
  func.func @transform_9(%arg0: i32) -> (i32, i32) {
    %c0_i32 = arith.constant 0 : i32
    %c0_i32_0 = arith.constant 0 : i32
    %c0_i32_1 = arith.constant 0 : i32
    return %c0_i32, %c0_i32_0 : i32, i32
  }
  func.func @transform_10(%arg0: i32) -> (i32, i32) {
    %c0_i32 = arith.constant 0 : i32
    %c0_i32_0 = arith.constant 0 : i32
    %c0_i32_1 = arith.constant 0 : i32
    return %c0_i32, %c0_i32_0 : i32, i32
  }
  func.func @transform_11(%arg0: i32) -> (i32, i32) {
    %c0_i32 = arith.constant 0 : i32
    %c0_i32_0 = arith.constant 0 : i32
    %c0_i32_1 = arith.constant 0 : i32
    return %c0_i32, %c0_i32_0 : i32, i32
  }
  func.func @transform_12(%arg0: i32) -> (i32, i32) {
    %c0_i32 = arith.constant 0 : i32
    %c0_i32_0 = arith.constant 0 : i32
    %c0_i32_1 = arith.constant 0 : i32
    return %c0_i32, %c0_i32_0 : i32, i32
  }
  func.func @transform_13(%arg0: i32) -> (i32, i32, i32) {
    %c0_i32 = arith.constant 0 : i32
    %c0_i32_0 = arith.constant 0 : i32
    %c0_i32_1 = arith.constant 0 : i32
    return %arg0, %c0_i32, %c0_i32_0 : i32, i32, i32
  }
}

</mosaic_0001>

<bundles_post_ra>
// kernel: tpu_custom_call.1
= control target key start
LH: loop header
LB: loop body
LE: loop exit
PB: predicated region body
PF: predicated region fallthrough
CT: control target
= control target key end

     0   :  { %vm91_vm0 = vcmask 64512   ;;  %vm99_vm1 = vcmask 195584   ;;  %s1889_s14 = smov 8   ;;  %s2940_s3 = inlined_call_operand.vmem [shape: f32[4,24,16], index: 3, kind: input, shape index: {}]   ;;  %s2941_s0 = inlined_call_operand.vmem [shape: f32[1,2,32,8], index: 0, kind: input, shape index: {}]   ;;  %s2942_s4 = inlined_call_operand.vmem [shape: f32[4,1,16], index: 4, kind: input, shape index: {}]   ;;  %s2943_s5 = inlined_call_operand.vmem [shape: f32[16,32], index: 5, kind: input, shape index: {}]   ;;  %s2944_s2 = inlined_call_operand.vmem [shape: f32[16,2], index: 2, kind: input, shape index: {}]   ;;  %s2945_s6 = inlined_call_operand.vmem [shape: f32[1,32], index: 6, kind: input, shape index: {}]   ;;  %s2946_s8 = inlined_call_operand.vmem [shape: f32[1,16], index: 8, kind: input, shape index: {}]   ;;  %s2947_s7 = inlined_call_operand.vmem [shape: f32[32,16], index: 7, kind: input, shape index: {}]   ;;  %s2948_s1 = inlined_call_operand.vmem [shape: f32[1,16,32], index: 1, kind: input, shape index: {}]   ;;  %s2949_s10 = inlined_call_operand.vmem [shape: f32[1,8], index: 10, kind: input, shape index: {}]   ;;  %s2950_s9 = inlined_call_operand.vmem [shape: f32[16,8], index: 9, kind: input, shape index: {}]   ;;  %s2951_s11 = inlined_call_operand.vmem [shape: f32[8,1], index: 11, kind: input, shape index: {}]   ;;  %s2952_s12 = inlined_call_operand.<no memory space> [shape: f32[1,1], index: 12, kind: input, shape index: {}]   ;;  %s2953_s13 = inlined_call_operand.vmem [shape: f32[1,16,2], index: 13, kind: output, shape index: {}]  }
   0x1   :  { %v1966_v0 = vld [vmem:[%s2940_s3 + $0x10] sm:$0xff]  ;;  %v1971_v1 = vld [vmem:[%s2940_s3 + $0x28] sm:$0xff]  ;;  %v1583_v2 = vld [vmem:[%s2940_s3 + $0x58] sm:$0xff] }
   0x2   :  { %125 = vmatpush.msra.mxu0 %v1966_v0  ;;  %233 = vmatpush.msra.mxu1 %v1971_v1  ;;  %v1981_v3 = vld [vmem:[%s2940_s3 + $0x8] sm:$0xff]  ;;  %v1986_v4 = vld [vmem:[%s2940_s3 + $0x20] sm:$0xff]  ;;  %v1582_v5 = vld [vmem:[%s2940_s3 + $0x50] sm:$0xff] }
   0x3   :  { %377 = vmatpush.msra.mxu3 %v1583_v2  ;;  %v1994_v6 = vld [vmem:[%s2940_s3] sm:$0xff]  ;;  %v1999_v7 = vld [vmem:[%s2940_s3 + $0x18] sm:$0xff]  ;;  %v1581_v8 = vld [vmem:[%s2940_s3 + $0x48] sm:$0xff] }
   0x4   :  { %126 = vmatpush.msra.mxu0 %v1981_v3  ;;  %234 = vmatpush.msra.mxu1 %v1986_v4  ;;  %v83_v9 = vld [vmem:[%s2941_s0] sm:$0xff]  ;;  %v1579_v12 = vld [vmem:[%s2940_s3 + $0x38] sm:$0xff]  ;;  %v1578_v13 = vld [vmem:[%s2940_s3 + $0x30] sm:$0xff] }
   0x5   :  { %v1580_v10 = vld [vmem:[%s2940_s3 + $0x40] sm:$0xff]  ;;  %378 = vmatpush.msra.mxu3 %v1582_v5  ;;  %v92_v11 = vsel %vm91_vm0, %v83_v9, 0.0  ;;  %v84_v14 = vld [vmem:[%s2941_s0 + $0x8] sm:$0xff]  ;;  %v85_v16 = vld [vmem:[%s2941_s0 + $0x10] sm:$0xff] }
   0x6   :  { %341 = vmatpush.msra.mxu2 %v1580_v10  ;;  %127 = vmatpush.msra.mxu0 %v1994_v6  ;;  %v2031_v15 = vsel %vm91_vm0, %v84_v14, 0.0  ;;  %v2047_v17 = vsel %vm91_vm0, %v85_v16, 0.0  ;;  %v86_v18 = vld [vmem:[%s2941_s0 + $0x18] sm:$0xff]  ;;  %v2076_v20 = vld [vmem:[%s2942_s4] ss:$0 sm:$0xff] }
   0x7   :  { %235 = vmatpush.msra.mxu1 %v1999_v7  ;;  %379 = vmatpush.msra.mxu3 %v1581_v8  ;;  %v2061_v19 = vsel %vm91_vm0, %v86_v18, 0.0  ;;  %v2081_v21 = vld [vmem:[%s2942_s4 + $0x1] ss:$0 sm:$0xff]  ;;  %v2088_v28 = vld [vmem:[%s2942_s4 + $0x3] ss:$0 sm:$0xff] }
   0x8   :  { %1587 = vmatmul.msk.f32.vlgmr.msra.gmra.mxu0 %vm99_vm1, %v92_v11  ;;  %1595 = vmatmul.msk.f32.vlgmr.msra.gmra.mxu1 %vm99_vm1, %v92_v11  ;;  %v2100_v43 = vld [vmem:[%s2942_s4 + $0x2] ss:$0 sm:$0xff] }
   0x9   :  { %1607 = vmatmul.msk.f32.vlgmr.msra.gmra.mxu3 %vm99_vm1, %v92_v11  ;;  %342 = vmatpush.msra.mxu2 %v1579_v12 }
   0xa   :  { %536 = vmatpush.msrb.mxu0 %v1966_v0  ;;  %581 = vmatpush.msrb.mxu1 %v1971_v1 }
   0xb   :  { %653 = vmatpush.msrb.mxu3 %v1583_v2  ;;  %343 = vmatpush.msra.mxu2 %v1578_v13 }
   0xc   :  { %537 = vmatpush.msrb.mxu0 %v1981_v3  ;;  %1603 = vmatmul.msk.f32.vlgmr.msra.gmra.mxu2 %vm99_vm1, %v92_v11 }
   0xd   :  { %582 = vmatpush.msrb.mxu1 %v1986_v4  ;;  %626 = vmatpush.msrb.mxu2 %v1580_v10 }
   0xe   :  { %654 = vmatpush.msrb.mxu3 %v1582_v5  ;;  %538 = vmatpush.msrb.mxu0 %v1994_v6 }
   0xf   :  { %583 = vmatpush.msrb.mxu1 %v1999_v7  ;;  %627 = vmatpush.msrb.mxu2 %v1579_v12 }
  0x10   :  { %1588 = vmatmul.msk.f32.gmra.mxu0 %vm99_vm1, %v2031_v15  ;;  %1596 = vmatmul.msk.f32.gmra.mxu1 %vm99_vm1, %v2031_v15 }
  0x11   :  { %1608 = vmatmul.msk.f32.gmra.mxu3 %vm99_vm1, %v2031_v15  ;;  %628 = vmatpush.msrb.mxu2 %v1578_v13 }
  0x12   :  { %655 = vmatpush.msrb.mxu3 %v1581_v8 }
  0x14   :  { %1604 = vmatmul.msk.f32.gmra.mxu2 %vm99_vm1, %v2031_v15 }
  0x18   :  { %1589 = vmatmul.msk.f32.gmra.mxu0 %vm99_vm1, %v2047_v17  ;;  %1597 = vmatmul.msk.f32.gmra.mxu1 %vm99_vm1, %v2047_v17 }
  0x19   :  { %1609 = vmatmul.msk.f32.gmra.mxu3 %vm99_vm1, %v2047_v17 }
  0x1c   :  { %1605 = vmatmul.msk.f32.gmra.mxu2 %vm99_vm1, %v2047_v17 }
  0x20   :  { %1590 = vmatmul.msk.f32.gmra.mxu0 %vm99_vm1, %v2061_v19  ;;  %1598 = vmatmul.msk.f32.gmra.mxu1 %vm99_vm1, %v2061_v19 }
  0x21   :  { %1610 = vmatmul.msk.f32.gmra.mxu3 %vm99_vm1, %v2061_v19 }
  0x24   :  { %1606 = vmatmul.msk.f32.gmra.mxu2 %vm99_vm1, %v2061_v19 }
  0x85   :  { %v129_v22 = vpop.f32.mrf.mxu0  ;;  %v237_v24 = vpop.f32.mrf.mxu1 }
  0x86   :  { %v130_v23 = vadd.f32 %v2076_v20, %v129_v22  ;;  %v238_v25 = vadd.f32 %v2081_v21, %v237_v24 }
  0x88   :  { %v1591_v26 = vmul.f32 -1.442695, %v130_v23  ;;  %v1599_v27 = vmul.f32 -1.442695, %v238_v25 }
  0x8a   :  { %1713 = vpow2.f32 %v1591_v26 }
  0x8b   :  { %1715 = vpow2.f32 %v1599_v27 }
  0x8c   :  { %v381_v29 = vpop.f32.mrf.mxu3 }
  0x8d   :  { %v382_v30 = vadd.f32 %v2088_v28, %v381_v29  ;;  %v132_v31 = vpop.f32.mrf.mxu0  ;;  %v240_v33 = vpop.f32.mrf.mxu1 }
  0x8e   :  { %v133_v32 = vadd.f32 %v2076_v20, %v132_v31  ;;  %v241_v35 = vadd.f32 %v2081_v21, %v240_v33 }
  0x8f   :  { %v1611_v34 = vmul.f32 -1.442695, %v382_v30  ;;  %v345_v38 = vpop.f32.mrf.mxu2 }
  0x90   :  { %v1714_v36 = vpop.eup %1713  ;;  %v1592_v37 = vmul.f32 -1.442695, %v133_v32  ;;  %v1600_v41 = vmul.f32 -1.442695, %v241_v35  ;;  %v346_v49 = vadd.f32 %v2100_v43, %v345_v38 }
  0x91   :  { %v1716_v39 = vpop.eup %1715  ;;  %v2093_v40 = vadd.f32 1.0, %v1714_v36  ;;  %1717 = vpow2.f32 %v1611_v34 }
  0x92   :  { %v2095_v42 = vadd.f32 1.0, %v1716_v39  ;;  %1719 = vpow2.f32 %v1592_v37 }
  0x93   :  { %1721 = vrcp.f32 %v2093_v40  ;;  %v168_v53 = vand.u32 2147483648, %v2093_v40  ;;  %v166_v56 = vand.u32 2147483647, %v2093_v40  ;;  %vm162_vm2 = vweird.f32 %v2093_v40 }
  0x94   :  { %1723 = vrcp.f32 %v2095_v42  ;;  %v384_v44 = vpop.f32.mrf.mxu3  ;;  %v276_v58 = vand.u32 2147483648, %v2095_v42  ;;  %v274_v8 = vand.u32 2147483647, %v2095_v42  ;;  %vm270_vm10 = vweird.f32 %v2095_v42 }
  0x95   :  { %1725 = vpow2.f32 %v1600_v41  ;;  %v385_v45 = vadd.f32 %v2088_v28, %v384_v44  ;;  %v135_v46 = vpop.f32.mrf.mxu0  ;;  %v243_v48 = vpop.f32.mrf.mxu1  ;;  %v169_v5 = vor.u32 1.1754944e-38, %v168_v53  ;;  %vm2126_vm3 = vcmp.eq.f32.partialorder %v166_v56, 8.507059e+37 }
  0x96   :  { %v136_v47 = vadd.f32 %v2076_v20, %v135_v46  ;;  %v244_v52 = vadd.f32 %v2081_v21, %v243_v48  ;;  %v2132_v22 = vor.u32 1.1754944e-38, %v276_v58  ;;  %vm2200_vm14 = vcmp.eq.f32.partialorder %v274_v8, 8.507059e+37 }
  0x97   :  { %v1718_v50 = vpop.eup %1717  ;;  %v1612_v51 = vmul.f32 -1.442695, %v385_v45  ;;  %v348_v63 = vpop.f32.mrf.mxu2 }
  0x98   :  { %v1720_v54 = vpop.eup %1719  ;;  %v1593_v55 = vmul.f32 -1.442695, %v136_v47  ;;  %v1601_v60 = vmul.f32 -1.442695, %v244_v52  ;;  %v2122_v10 = vadd.f32 1.0, %v1718_v50  ;;  %v349_v18 = vadd.f32 %v2100_v43, %v348_v63 }
  0x99   :  { %v2110_v57 = vpop.eup %1721  ;;  %v2113_v59 = vadd.f32 1.0, %v1720_v54  ;;  %1727 = vpow2.f32 %v1612_v51 }
  0x9a   :  { %v2115_v61 = vpop.eup %1723  ;;  %v158_v62 = vmul.f32 %v2110_v57, %v2093_v40  ;;  %1729 = vtanh.f32 %v346_v49  ;;  %vm163_vm4 = vweird.f32 %v2110_v57 }
  0x9b   :  { %v1726_v2 = vpop.eup %1725  ;;  %1731 = vrcp.f32 %v2113_v59  ;;  %v266_v23 = vmul.f32 %v2115_v61, %v2095_v42  ;;  %v181_v26 = vand.u32 2147483647, %v2113_v59  ;;  %vm177_vm5 = vweird.f32 %v2113_v59  ;;  %vm2154_vm6 = vmor %vm162_vm2, %vm163_vm4 }
  0x9c   :  { %v159_v9 = vsub.f32 1.0, %v158_v62  ;;  %v2124_v11 = vadd.f32 1.0, %v1726_v2  ;;  %1733 = vpow2.f32 %v1593_v55  ;;  %v387_v12 = vpop.f32.mrf.mxu3  ;;  %v183_v38 = vand.u32 2147483648, %v2113_v59 }
  0x9d   :  { %1735 = vpow2.f32 %v1601_v60  ;;  %v388_v14 = vadd.f32 %v2088_v28, %v387_v12  ;;  %v138_v16 = vpop.f32.mrf.mxu0  ;;  %v246_v25 = vpop.f32.mrf.mxu1  ;;  %v267_v41 = vsub.f32 1.0, %v266_v23  ;;  %vm2158_vm7 = vcmp.eq.f32.partialorder %v181_v26, 8.507059e+37 }
  0x9e   :  { %1737 = vrcp.f32 %v2124_v11  ;;  %v160_v24 = vmul.f32 %v2110_v57, %v159_v9  ;;  %v139_v30 = vadd.f32 %v2076_v20, %v138_v16  ;;  %v247_v31 = vadd.f32 %v2081_v21, %v246_v25 }
  0x9f   :  { %v1728_v27 = vpop.eup %1727  ;;  %v1613_v29 = vmul.f32 -1.442695, %v388_v14  ;;  %1739 = vrcp.f32 %v2122_v10  ;;  %v291_v48 = vand.u32 2147483648, %v2124_v11  ;;  %v289_v53 = vand.u32 2147483647, %v2124_v11 }
  0xa0   :  { %v1730_v32 = vpop.eup %1729  ;;  %v2143_v33 = vadd.f32 1.0, %v1728_v27  ;;  %v161_v34 = vadd.f32 %v2110_v57, %v160_v24  ;;  %v1594_v36 = vmul.f32 -1.442695, %v139_v30  ;;  %v1602_v37 = vmul.f32 -1.442695, %v247_v31 }
  0xa1   :  { %v1732_v35 = vpop.eup %1731  ;;  %1741 = vpow2.f32 %v1613_v29  ;;  %vm285_vm8 = vweird.f32 %v2124_v11  ;;  %v268_v63 = vmul.f32 %v2115_v61, %v267_v41  ;;  %v292_v14 = vor.u32 1.1754944e-38, %v291_v48 }
  0xa2   :  { %v1734_v39 = vpop.eup %1733  ;;  %v173_v44 = vmul.f32 %v1732_v35, %v2113_v59  ;;  %1743 = vrcp.f32 %v2143_v33  ;;  %v165_v50 = vsel %vm2154_vm6, %v2110_v57, %v161_v34  ;;  %vm178_vm9 = vweird.f32 %v1732_v35 }
  0xa3   :  { %v1736_v47 = vpop.eup %1735  ;;  %v2163_v49 = vadd.f32 1.0, %v1734_v39  ;;  %1745 = vpow2.f32 %v1594_v36  ;;  %v170_v58 = vsel %vm2126_vm3, %v169_v5, %v165_v50  ;;  %v184_v23 = vor.u32 1.1754944e-38, %v183_v38  ;;  %vm179_vm12 = vmor %vm177_vm5, %vm178_vm9 }
  0xa4   :  { %v2168_v51 = vpop.eup %1737  ;;  %v174_v40 = vsub.f32 1.0, %v173_v44  ;;  %v2170_v52 = vadd.f32 1.0, %v1736_v47  ;;  %1747 = vpow2.f32 %v1602_v37  ;;  %v390_v54 = vpop.f32.mrf.mxu3  ;;  %vm2187_vm11 = vcmp.eq.f32.partialorder %v289_v53, 8.507059e+37 }
  0xa5   :  { %v281_v55 = vmul.f32 %v2168_v51, %v2124_v11  ;;  %1749 = vrcp.f32 %v2163_v49  ;;  %v391_v56 = vadd.f32 %v2088_v28, %v390_v54  ;;  %v2178_v57 = vpop.eup %1739  ;;  %v2192_v25 = vmul.f32 %v1730_v32, %v170_v58  ;;  %v351_v32 = vpop.f32.mrf.mxu2 }
  0xa6   :  { %1751 = vrcp.f32 %v2170_v52  ;;  %v175_v60 = vmul.f32 %v1732_v35, %v174_v40  ;;  %vm286_vm13 = vweird.f32 %v2168_v51  ;;  %v306_v27 = vand.u32 2147483648, %v2170_v52 }
  0xa7   :  { %v1742_v62 = vpop.eup %1741  ;;  %v282_v2 = vsub.f32 1.0, %v281_v55  ;;  %1753 = vtanh.f32 %v349_v18  ;;  %v1614_v9 = vmul.f32 -1.442695, %v391_v56  ;;  %v196_v37 = vand.u32 2147483647, %v2163_v49  ;;  %vm287_vm15 = vmor %vm285_vm8, %vm286_vm13 }
  0xa8   :  { %v2185_v12 = vpop.eup %1743  ;;  %v176_v16 = vadd.f32 %v1732_v35, %v175_v60  ;;  %v2205_v29 = vadd.f32 1.0, %v1742_v62  ;;  %v198_v41 = vand.u32 2147483648, %v2163_v49  ;;  %vm192_vm2 = vweird.f32 %v2163_v49 }
  0xa9   :  { %v1746_v5 = vpop.eup %1745  ;;  %v283_v13 = vmul.f32 %v2168_v51, %v282_v2  ;;  %1755 = vpow2.f32 %v1614_v9  ;;  %v2221_v39 = vmul.f32 %v2185_v12, %v2143_v33  ;;  %v352_v46 = vadd.f32 %v2100_v43, %v351_v32 }
  0xaa   :  { %v1748_v26 = vpop.eup %1747  ;;  %v2207_v30 = vadd.f32 1.0, %v1746_v5  ;;  %v180_v31 = vsel %vm179_vm12, %v1732_v35, %v176_v16  ;;  %v269_v47 = vadd.f32 %v2115_v61, %v268_v63  ;;  %vm271_vm3 = vweird.f32 %v2115_v61 }
  0xab   :  { %v2209_v59 = vpop.eup %1749  ;;  %v2211_v34 = vadd.f32 1.0, %v1748_v26  ;;  %v185_v36 = vsel %vm2158_vm7, %v184_v23, %v180_v31  ;;  %v284_v8 = vadd.f32 %v2168_v51, %v283_v13  ;;  %vm414_vm4 = vweird.f32 %v2122_v10  ;;  %vm272_vm5 = vmor %vm270_vm10, %vm271_vm3 }
  0xac   :  { %v2217_v38 = vpop.eup %1751  ;;  %v188_v35 = vmul.f32 %v2209_v59, %v2163_v49  ;;  %1757 = vrcp.f32 %v2207_v30  ;;  %vm193_vm6 = vweird.f32 %v2209_v59  ;;  %vm2252_vm7 = vcmp.eq.f32.partialorder %v196_v37, 8.507059e+37 }
  0xad   :  { %v1754_v44 = vpop.eup %1753  ;;  %v296_v45 = vmul.f32 %v2217_v38, %v2170_v52  ;;  %1759 = vrcp.f32 %v2211_v34  ;;  %v288_v50 = vsel %vm287_vm15, %v2168_v51, %v284_v8  ;;  %v321_v55 = vand.u32 2147483648, %v2211_v34 }
  0xae   :  { %v189_v48 = vsub.f32 1.0, %v188_v35  ;;  %1761 = vrcp.f32 %v2205_v29  ;;  %v474_v40 = vmul.f32 %v1754_v44, %v185_v36  ;;  %v293_v11 = vsel %vm2187_vm11, %v292_v14, %v288_v50  ;;  %vm2280_vm11 = vmor %vm192_vm2, %vm193_vm6 }
  0xaf   :  { %v1756_v53 = vpop.eup %1755  ;;  %v297_v54 = vsub.f32 1.0, %v296_v45  ;;  %v470_v56 = vmul.f32 0.0, %v293_v11  ;;  %v410_v51 = vmul.f32 %v2178_v57, %v2122_v10  ;;  %v199_v63 = vor.u32 1.1754944e-38, %v198_v41 }
  0xb0   :  { %v2244_v58 = vadd.f32 1.0, %v1756_v53  ;;  %v190_v60 = vmul.f32 %v2209_v59, %v189_v48  ;;  %v273_v2 = vsel %vm272_vm5, %v2115_v61, %v269_v47  ;;  %vm315_vm8 = vweird.f32 %v2211_v34 }
  0xb1   :  { %v478_v14 = vadd.f32 %v474_v40, %v470_v56  ;;  %v278_v42 = vsel %vm2200_vm14, %v2132_v22, %v273_v2  ;;  %v418_v16 = vand.u32 2147483647, %v2122_v10  ;;  %v411_v61 = vsub.f32 1.0, %v410_v51 }
  0xb2   :  { %v2257_v9 = vpop.eup %1757  ;;  %1763 = vrcp.f32 %v2244_v58  ;;  %v191_v5 = vadd.f32 %v2209_v59, %v190_v60  ;;  %v298_v26 = vmul.f32 %v2217_v38, %v297_v54  ;;  %v322_v32 = vor.u32 1.1754944e-38, %v321_v55 }
  0xb3   :  { %v1760_v23 = vpop.eup %1759  ;;  %v203_v24 = vmul.f32 %v2257_v9, %v2207_v30  ;;  %1765 = vtanh.f32 %v352_v46  ;;  %v469_v36 = vmul.f32 0.0, %v278_v42  ;;  %v412_v22 = vmul.f32 %v2178_v57, %v411_v61 }
  0xb4   :  { %v2268_v13 = vpop.eup %1761  ;;  %v311_v31 = vmul.f32 %v1760_v23, %v2211_v34  ;;  %vm415_vm9 = vweird.f32 %v2178_v57  ;;  %v420_v8 = vand.u32 2147483648, %v2122_v10  ;;  %vm300_vm10 = vweird.f32 %v2170_v52 }
  0xb5   :  { %v204_v18 = vsub.f32 1.0, %v203_v24  ;;  %1767 = vtanh.f32 %v478_v14  ;;  %vm2284_vm12 = vcmp.eq.f32.partialorder %v418_v16, 8.507059e+37  ;;  %v477_v44 = vadd.f32 %v2192_v25, %v469_v36  ;;  %vm2299_vm14 = vmor %vm414_vm4, %vm415_vm9 }
  0xb6   :  { %v312_v37 = vsub.f32 1.0, %v311_v31  ;;  %v195_v45 = vsel %vm2280_vm11, %v2209_v59, %v191_v5  ;;  %v413_v46 = vadd.f32 %v2178_v57, %v412_v22  ;;  %vm208_vm13 = vweird.f32 %v2257_v9  ;;  %v354_v59 = vpop.f32.mrf.mxu2 }
  0xb7   :  { %v205_v47 = vmul.f32 %v2257_v9, %v204_v18  ;;  %1769 = vtanh.f32 %v477_v44  ;;  %v213_v25 = vand.u32 2147483648, %v2207_v30  ;;  %vm316_vm15 = vweird.f32 %v1760_v23 }
  0xb8   :  { %v2295_v49 = vpop.eup %1763  ;;  %v313_v48 = vmul.f32 %v1760_v23, %v312_v37  ;;  %v417_v53 = vsel %vm2299_vm14, %v2178_v57, %v413_v46  ;;  %v421_v54 = vor.u32 1.1754944e-38, %v420_v8  ;;  %vm207_vm2 = vweird.f32 %v2207_v30  ;;  %vm317_vm4 = vmor %vm315_vm8, %vm316_vm15 }
  0xb9   :  { %v1766_v40 = vpop.eup %1765  ;;  %v206_v55 = vadd.f32 %v2257_v9, %v205_v47  ;;  %v200_v10 = vsel %vm2252_vm7, %v199_v63, %v195_v45  ;;  %vm2311_vm3 = vmor %vm207_vm2, %vm208_vm13  ;;  %v211_v56 = vand.u32 2147483647, %v2207_v30  ;;  %v319_v51 = vand.u32 2147483647, %v2211_v34 }
  0xba   :  { %v314_v60 = vadd.f32 %v1760_v23, %v313_v48  ;;  %v455_v57 = vmul.f32 %v2295_v49, %v2244_v58  ;;  %v422_v2 = vsel %vm2284_vm12, %v421_v54, %v417_v53  ;;  %v355_v62 = vadd.f32 %v2100_v43, %v354_v59 }
  0xbb   :  { %v426_v63 = vsub.f32 1.0, %v2221_v39  ;;  %v1768_v14 = vpop.eup %1767  ;;  %v210_v30 = vsel %vm2311_vm3, %v2257_v9, %v206_v55  ;;  %v214_v42 = vor.u32 1.1754944e-38, %v213_v25  ;;  %vm429_vm5 = vweird.f32 %v2143_v33 }
  0xbc   :  { %v318_v16 = vsel %vm317_vm4, %v1760_v23, %v314_v60  ;;  %vm320_vm6 = vcmp.eq.f32.partialorder %v319_v51, 8.507059e+37  ;;  %1771 = vtanh.f32 %v355_v62  ;;  %vm430_vm7 = vweird.f32 %v2185_v12 }
  0xbd   :  { %v427_v24 = vmul.f32 %v2185_v12, %v426_v63  ;;  %v1770_v34 = vpop.eup %1769  ;;  %v323_v5 = vsel %vm320_vm6, %v322_v32, %v318_v16  ;;  %v435_v61 = vand.u32 2147483648, %v2143_v33  ;;  %v299_v39 = vadd.f32 %v2217_v38, %v298_v26  ;;  %vm2345_vm12 = vmor %vm429_vm5, %vm430_vm7 }
  0xbe   :  { %vm301_vm8 = vweird.f32 %v2217_v38  ;;  %v485_v31 = vmul.f32 %v1770_v34, %v422_v2  ;;  %v433_v23 = vand.u32 2147483647, %v2143_v33  ;;  %v304_v18 = vand.u32 2147483647, %v2170_v52  ;;  %v693_v34 = vld [vmem:[%s2944_s2] sm:$0xff] }
  0xbf   :  { %v428_v9 = vadd.f32 %v2185_v12, %v427_v24  ;;  %vm2338_vm9 = vmor %vm300_vm10, %vm301_vm8  ;;  %vm212_vm11 = vcmp.eq.f32.partialorder %v211_v56, 8.507059e+37  ;;  %v307_v22 = vor.u32 1.1754944e-38, %v306_v27  ;;  %v440_v8 = vmul.f32 %v2268_v13, %v2205_v29 }
  0xc0   :  { %v303_v32 = vsel %vm2338_vm9, %v2217_v38, %v299_v39  ;;  %v475_v37 = vmul.f32 %v1766_v40, %v200_v10  ;;  %495 = vrot.lane.b32.xlu0 %v485_v31, %s1889_s14  ;;  %v215_v35 = vsel %vm212_vm11, %v214_v42, %v210_v30  ;;  %vm305_vm10 = vcmp.eq.f32.partialorder %v304_v18, 8.507059e+37  ;;  %v90_v18 = vld [vmem:[%s2941_s0 + $0x38] sm:$0xff] }
  0xc1   :  { %v432_v33 = vsel %vm2345_vm12, %v2185_v12, %v428_v9  ;;  %v472_v41 = vmul.f32 0.0, %v323_v5  ;;  %v436_v44 = vor.u32 1.1754944e-38, %v435_v61  ;;  %v308_v45 = vsel %vm305_vm10, %v307_v22, %v303_v32  ;;  %v88_v61 = vld [vmem:[%s2941_s0 + $0x28] sm:$0xff]  ;;  %v89_v9 = vld [vmem:[%s2941_s0 + $0x30] sm:$0xff] }
  0xc2   :  { %v441_v38 = vsub.f32 1.0, %v440_v8  ;;  %v1772_v46 = vpop.eup %1771  ;;  %vm434_vm13 = vcmp.eq.f32.partialorder %v433_v23, 8.507059e+37  ;;  %v471_v52 = vmul.f32 0.0, %v308_v45  ;;  %v456_v27 = vsub.f32 1.0, %v455_v57  ;;  %v2438_v45 = vld [vmem:[%s2947_s7 + $0x18] sm:$0xff] }
  0xc3   :  { %v476_v47 = vmul.f32 %v1772_v46, %v215_v35  ;;  %v437_v48 = vsel %vm434_vm13, %v436_v44, %v432_v33  ;;  %vm445_vm14 = vweird.f32 %v2268_v13  ;;  %v450_v54 = vand.u32 2147483648, %v2205_v29  ;;  %765 = vmatpush.msra.mxu1 %v2438_v45 }
  0xc4   :  { %v442_v50 = vmul.f32 %v2268_v13, %v441_v38  ;;  %v486_v25 = vmul.f32 %v1768_v14, %v437_v48  ;;  %v479_v59 = vadd.f32 %v475_v37, %v471_v52  ;;  %v457_v40 = vmul.f32 %v2295_v49, %v456_v27  ;;  %v2450_v38 = vld [vmem:[%s2947_s7 + $0x8] sm:$0xff]  ;;  %v2456_v27 = vld [vmem:[%s2947_s7] sm:$0xff] }
  0xc5   :  { %v2362_v53 = vadd.f32 %v476_v47, %v472_v41  ;;  %vm460_vm15 = vweird.f32 %v2295_v49  ;;  %vm444_vm2 = vweird.f32 %v2205_v29  ;;  %v448_v10 = vand.u32 2147483647, %v2205_v29 }
  0xc6   :  { %v443_v12 = vadd.f32 %v2268_v13, %v442_v50  ;;  %1773 = vtanh.f32 %v479_v59  ;;  %v458_v55 = vadd.f32 %v2295_v49, %v457_v40  ;;  %v465_v11 = vand.u32 2147483648, %v2244_v58  ;;  %vm446_vm3 = vmor %vm444_vm2, %vm445_vm14 }
  0xc7   :  { %1775 = vtanh.f32 %v2362_v53  ;;  %vm459_vm4 = vweird.f32 %v2244_v58  ;;  %v463_v56 = vand.u32 2147483647, %v2244_v58  ;;  %v451_v51 = vor.u32 1.1754944e-38, %v450_v54  ;;  %v2384_v58 = vld [vmem:[%s2943_s5 + $0x8] sm:$0xff] }
  0xc8   :  { %497 = vrot.lane.b32.xlu0 %v486_v25, %s1889_s14  ;;  %v447_v60 = vsel %vm446_vm3, %v2268_v13, %v443_v12  ;;  %vm461_vm5 = vmor %vm459_vm4, %vm460_vm15  ;;  %vm449_vm6 = vcmp.eq.f32.partialorder %v448_v10, 8.507059e+37  ;;  %v466_v2 = vor.u32 1.1754944e-38, %v465_v11  ;;  %vm489_vm8 = vcmask 130048   ;;  %v2389_v13 = vld [vmem:[%s2943_s5] sm:$0xff]  ;;  %715 = vmatpush.msra.mxu0 %v2384_v58 }
  0xc9   :  { %v462_v57 = vsel %vm461_vm5, %v2295_v49, %v458_v55  ;;  %v452_v62 = vsel %vm449_vm6, %v451_v51, %v447_v60  ;;  %vm464_vm7 = vcmp.eq.f32.partialorder %v463_v56, 8.507059e+37  ;;  %v87_v49 = vld [vmem:[%s2941_s0 + $0x20] sm:$0xff]  ;;  %v1890_v5 = vmov 0  }
  0xca   :  { %v467_v30 = vsel %vm464_vm7, %v466_v2, %v462_v57  ;;  %716 = vmatpush.msra.mxu0 %v2389_v13  ;;  %1701 = vset.pattern.permute.xlu2 %v1890_v5  ;;  %v2467_v55 = vld [vmem:[%s2945_s6] ss:$0 sm:$0xff]  ;;  %vm746_vm9 = vcmask 261120  }
  0xcb   :  { %726 = vperm.xlu2 %1701, %v693_v34   ;;  %v81_v11 = vld [vmem:[%s2948_s1] sm:$0xff] }
  0xcc   :  { %v1774_v29 = vpop.eup %1773 }
  0xcd   :  { %v1776_v63 = vpop.eup %1775  ;;  %v487_v14 = vmul.f32 %v1774_v29, %v452_v62 }
  0xce   :  { %v488_v42 = vmul.f32 %v1776_v63, %v467_v30 }
  0xcf   :  { %499 = vrot.lane.b32.xlu1 %v487_v14, %s1889_s14 }
  0xd0   :  { %490 = vst.msk [vmem:[#allocation2] sm:$0xff] %vm489_vm8, %v488_v42 }
  0xd7   :  { %501 = vrot.lane.b32.xlu1 %v488_v42, %s1889_s14  ;;  %v691_v22 = vld [vmem:[#allocation2] sm:$0xff] }
 0x125   :  { %v727_v10 = vpop.permute.xlu2 %726 }
 0x126   :  { %v737_v60 = vmul.f32 %v2467_v55, %v727_v10 }
 0x132   :  { %v496_v16 = vpop.permute.xlu0 %495 }
 0x133   :  { %v507_v24 = vsel %vm91_vm0, %v87_v49, %v496_v16 }
 0x134   :  { %1615 = vmatmul.msk.f32.vlgmr.msrb.gmra.mxu0 %vm99_vm1, %v507_v24  ;;  %1620 = vmatmul.msk.f32.vlgmr.msrb.gmra.mxu1 %vm99_vm1, %v507_v24 }
 0x135   :  { %1625 = vmatmul.msk.f32.vlgmr.msrb.gmra.mxu2 %vm99_vm1, %v507_v24  ;;  %1629 = vmatmul.msk.f32.vlgmr.msrb.gmra.mxu3 %vm99_vm1, %v507_v24 }
 0x136   :  { %861 = vmatpush.msrb.mxu0 %v1966_v0 }
 0x138   :  { %862 = vmatpush.msrb.mxu0 %v1981_v3 }
 0x13a   :  { %v498_v39 = vpop.permute.xlu0 %497  ;;  %863 = vmatpush.msrb.mxu0 %v1994_v6 }
 0x13b   :  { %v508_v31 = vsel %vm91_vm0, %v88_v61, %v498_v39  ;;  %v2482_v61 = vld [vmem:[%s2944_s2 + $0x8] sm:$0xff] }
 0x13c   :  { %1616 = vmatmul.msk.f32.gmra.mxu0 %vm99_vm1, %v508_v31  ;;  %1621 = vmatmul.msk.f32.gmra.mxu1 %vm99_vm1, %v508_v31 }
 0x13d   :  { %1626 = vmatmul.msk.f32.gmra.mxu2 %vm99_vm1, %v508_v31  ;;  %1630 = vmatmul.msk.f32.gmra.mxu3 %vm99_vm1, %v508_v31 }
 0x13e   :  { %731 = vperm.xlu2 %1701, %v2482_v61  }
 0x141   :  { %v500_v23 = vpop.permute.xlu1 %499 }
 0x142   :  { %v509_v36 = vsel %vm91_vm0, %v89_v9, %v500_v23 }
 0x144   :  { %1617 = vmatmul.msk.f32.gmra.mxu0 %vm99_vm1, %v509_v36  ;;  %1622 = vmatmul.msk.f32.gmra.mxu1 %vm99_vm1, %v509_v36 }
 0x145   :  { %1627 = vmatmul.msk.f32.gmra.mxu2 %vm99_vm1, %v509_v36  ;;  %1631 = vmatmul.msk.f32.gmra.mxu3 %vm99_vm1, %v509_v36 }
 0x149   :  { %v502_v26 = vpop.permute.xlu1 %501 }
 0x14a   :  { %v510_v32 = vsel %vm91_vm0, %v90_v18, %v502_v26 }
 0x14c   :  { %1618 = vmatmul.msk.f32.gmra.mxu0 %vm99_vm1, %v510_v32  ;;  %1623 = vmatmul.msk.f32.gmra.mxu1 %vm99_vm1, %v510_v32 }
 0x14d   :  { %1628 = vmatmul.msk.f32.gmra.mxu2 %vm99_vm1, %v510_v32  ;;  %1632 = vmatmul.msk.f32.gmra.mxu3 %vm99_vm1, %v510_v32 }
 0x154   :  { %1634 = vmatmul.msk.f32.vlgmr.msra.gmra.mxu0 %vm489_vm8, %v691_v22 }
 0x155   :  { %1262 = vmatpush.msra.mxu0 %v1966_v0  ;;  %v2444_v0 = vld [vmem:[%s2947_s7 + $0x10] sm:$0xff] }
 0x156   :  { %766 = vmatpush.msra.mxu1 %v2444_v0 }
 0x157   :  { %1263 = vmatpush.msra.mxu0 %v1981_v3 }
 0x158   :  { %767 = vmatpush.msra.mxu1 %v2450_v38 }
 0x159   :  { %1264 = vmatpush.msra.mxu0 %v1994_v6 }
 0x15a   :  { %768 = vmatpush.msra.mxu1 %v2456_v27 }
 0x15c   :  { %966 = vmatpush.msrb.mxu1 %v1971_v1 }
 0x15e   :  { %967 = vmatpush.msrb.mxu1 %v1986_v4 }
 0x160   :  { %968 = vmatpush.msrb.mxu1 %v1999_v7 }
 0x1b1   :  { %v540_v8 = vpop.f32.mrf.mxu0  ;;  %v585_v37 = vpop.f32.mrf.mxu1 }
 0x1b8   :  { %v630_v35 = vpop.f32.mrf.mxu2  ;;  %v657_v33 = vpop.f32.mrf.mxu3 }
 0x1b9   :  { %v542_v41 = vpop.f32.mrf.mxu0  ;;  %v587_v44 = vpop.f32.mrf.mxu1 }
 0x1c0   :  { %v632_v3 = vpop.f32.mrf.mxu2  ;;  %v659_v6 = vpop.f32.mrf.mxu3 }
 0x1c1   :  { %v544_v46 = vpop.f32.mrf.mxu0  ;;  %v589_v52 = vpop.f32.mrf.mxu1 }
 0x1c8   :  { %v634_v47 = vpop.f32.mrf.mxu2  ;;  %v661_v48 = vpop.f32.mrf.mxu3 }
 0x1c9   :  { %v546_v50 = vpop.f32.mrf.mxu0  ;;  %v591_v25 = vpop.f32.mrf.mxu1 }
 0x1ca   :  { %v547_v59 = vadd.f32 %v2076_v20, %v546_v50  ;;  %v592_v40 = vadd.f32 %v2081_v21, %v591_v25 }
 0x1cc   :  { %v1619_v12 = vmul.f32 -1.442695, %v547_v59  ;;  %v1624_v54 = vmul.f32 -1.442695, %v592_v40 }
 0x1ce   :  { %1777 = vpow2.f32 %v1619_v12 }
 0x1cf   :  { %1779 = vpow2.f32 %v1624_v54 }
 0x1d0   :  { %v663_v56 = vpop.f32.mrf.mxu3  ;;  %v636_v42 = vpop.f32.mrf.mxu2 }
 0x1d1   :  { %v664_v20 = vadd.f32 %v2088_v28, %v663_v56  ;;  %v718_v21 = vpop.f32.mrf.mxu0  ;;  %v637_v24 = vadd.f32 %v2100_v43, %v636_v42 }
 0x1d2   :  { %v719_v51 = vadd.f32 %v718_v21, %v81_v11  ;;  %v2514_v21 = vld [vmem:[%s2946_s8] ss:$0 sm:$0xff] }
 0x1d3   :  { %v1633_v57 = vmul.f32 -1.442695, %v664_v20  ;;  %v1875_v20 = vld [vmem:[%s2940_s3 + $0x30] sm:$0xff] }
 0x1d4   :  { %v1778_v2 = vpop.eup %1777  ;;  %v739_v29 = vadd.f32 %v737_v60, %v719_v51  ;;  %v76_v60 = vld [vmem:[%s2950_s9] sm:$0xff] }
 0x1d5   :  { %v1780_v62 = vpop.eup %1779  ;;  %v552_v63 = vadd.f32 1.0, %v1778_v2  ;;  %1781 = vpow2.f32 %v1633_v57 }
 0x1d6   :  { %v597_v14 = vadd.f32 1.0, %v1780_v62  ;;  %v741_v30 = vmax.f32 %v739_v29, 0.0  ;;  %v732_v29 = vpop.permute.xlu2 %731  ;;  %v2521_v62 = vld [vmem:[%s2948_s1 + $0x8] sm:$0xff] }
 0x1d7   :  { %1783 = vrcp.f32 %v552_v63  ;;  %v562_v43 = vand.u32 2147483647, %v552_v63  ;;  %vm558_vm10 = vweird.f32 %v552_v63 }
 0x1d8   :  { %1785 = vrcp.f32 %v597_v14  ;;  %1636 = vmatmul.msk.f32.vlgmr.msra.gmra.mxu1 %vm746_vm9, %v741_v30  ;;  %v609_v9 = vand.u32 2147483648, %v597_v14  ;;  %v607_v36 = vand.u32 2147483647, %v597_v14  ;;  %vm603_vm13 = vweird.f32 %v597_v14 }
 0x1d9   :  { %1307 = vmatpush.msra.mxu1 %v1971_v1  ;;  %vm563_vm2 = vcmp.eq.f32.partialorder %v562_v43, 8.507059e+37 }
 0x1da   :  { %v610_v37 = vor.u32 1.1754944e-38, %v609_v9  ;;  %vm608_vm3 = vcmp.eq.f32.partialorder %v607_v36, 8.507059e+37 }
 0x1db   :  { %v1782_v49 = vpop.eup %1781  ;;  %1308 = vmatpush.msra.mxu1 %v1986_v4  ;;  %v564_v4 = vand.u32 2147483648, %v552_v63 }
 0x1dc   :  { %v669_v28 = vadd.f32 1.0, %v1782_v49 }
 0x1dd   :  { %v1784_v16 = vpop.eup %1783  ;;  %1309 = vmatpush.msra.mxu1 %v1999_v7  ;;  %v565_v32 = vor.u32 1.1754944e-38, %v564_v4 }
 0x1de   :  { %v1786_v34 = vpop.eup %1785  ;;  %v554_v5 = vmul.f32 %v1784_v16, %v552_v63  ;;  %1787 = vrcp.f32 %v669_v28  ;;  %vm559_vm11 = vweird.f32 %v1784_v16  ;;  %v681_v25 = vand.u32 2147483648, %v669_v28 }
 0x1df   :  { %v599_v39 = vmul.f32 %v1786_v34, %v597_v14  ;;  %1789 = vtanh.f32 %v637_v24  ;;  %vm604_vm12 = vweird.f32 %v1786_v34  ;;  %vm560_vm14 = vmor %vm558_vm10, %vm559_vm11  ;;  %vm675_vm5 = vweird.f32 %v669_v28 }
 0x1e0   :  { %v555_v1 = vsub.f32 1.0, %v554_v5  ;;  %vm605_vm15 = vmor %vm603_vm13, %vm604_vm12  ;;  %v679_v59 = vand.u32 2147483647, %v669_v28  ;;  %v682_v12 = vor.u32 1.1754944e-38, %v681_v25  ;;  %v738_v14 = vmul.f32 %v2467_v55, %v732_v29  ;;  %v79_v55 = vld [vmem:[%s2951_s11] sm:$0xff] }
 0x1e1   :  { %v600_v31 = vsub.f32 1.0, %v599_v39  ;;  %836 = vmatpush.msra.mxu3 %v79_v55 }
 0x1e2   :  { %v556_v23 = vmul.f32 %v1784_v16, %v555_v1  ;;  %vm680_vm7 = vcmp.eq.f32.partialorder %v679_v59, 8.507059e+37 }
 0x1e3   :  { %v601_v7 = vmul.f32 %v1786_v34, %v600_v31  ;;  %v18_v31 = vstv %s2952_s12 }
 0x1e4   :  { %v1788_v18 = vpop.eup %1787  ;;  %v557_v26 = vadd.f32 %v1784_v16, %v556_v23  ;;  %19 = vst [vmem:[#allocation3] sm:$0x1] %v18_v31 }
 0x1e5   :  { %v602_v22 = vadd.f32 %v1786_v34, %v601_v7  ;;  %v671_v8 = vmul.f32 %v1788_v18, %v669_v28  ;;  %v1790_v33 = vpop.eup %1789  ;;  %vm676_vm4 = vweird.f32 %v1788_v18 }
 0x1e6   :  { %v561_v35 = vsel %vm560_vm14, %v1784_v16, %v557_v26  ;;  %vm677_vm6 = vmor %vm675_vm5, %vm676_vm4  ;;  %v2585_v26 = vld [vmem:[%s2942_s4 + $0x1] ss:$0 sm:$0xff] }
 0x1e7   :  { %v566_v41 = vsel %vm563_vm2, %v565_v32, %v561_v35  ;;  %v606_v44 = vsel %vm605_vm15, %v1786_v34, %v602_v22  ;;  %v672_v3 = vsub.f32 1.0, %v671_v8 }
 0x1e8   :  { %v611_v6 = vsel %vm608_vm3, %v610_v37, %v606_v44  ;;  %v686_v46 = vmul.f32 %v1790_v33, %v566_v41 }
 0x1e9   :  { %v685_v52 = vmul.f32 %v611_v6, %v2362_v53  ;;  %v673_v47 = vmul.f32 %v1788_v18, %v672_v3  ;;  %v77_v53 = vld [vmem:[%s2950_s9 + $0x8] sm:$0xff] }
 0x1ea   :  { %801 = vmatpush.msra.mxu2 %v77_v53 }
 0x1eb   :  { %v687_v48 = vadd.f32 %v686_v46, %v685_v52  ;;  %v674_v50 = vadd.f32 %v1788_v18, %v673_v47 }
 0x1ec   :  { %802 = vmatpush.msra.mxu2 %v76_v60 }
 0x1ed   :  { %1791 = vtanh.f32 %v687_v48  ;;  %v678_v40 = vsel %vm677_vm6, %v1788_v18, %v674_v50 }
 0x1ee   :  { %v683_v10 = vsel %vm680_vm7, %v682_v12, %v678_v40 }
 0x1f3   :  { %v1792_v54 = vpop.eup %1791 }
 0x1f4   :  { %v689_v11 = vmul.f32 %v1792_v54, %v683_v10 }
 0x1f6   :  { %690 = vst.msk [vmem:[#allocation2 + $0x8] sm:$0xff] %vm489_vm8, %v689_v11 }
 0x1fd   :  { %v692_v56 = vld [vmem:[#allocation2 + $0x8] sm:$0xff] }
 0x1fe   :  { %1635 = vmatmul.msk.f32.gmra.mxu0 %vm489_vm8, %v692_v56 }
 0x206   :  { %1642 = vmatmul.msk.f32.vlgmr.msrb.gmra.mxu0 %vm99_vm1, %v2031_v15 }
 0x207   :  { %1441 = vmatpush.msrb.mxu0 %v2384_v58  ;;  %v1873_v58 = vld [vmem:[%s2940_s3 + $0x40] sm:$0xff] }
 0x208   :  { %1071 = vmatpush.msrb.mxu2 %v1873_v58 }
 0x209   :  { %1442 = vmatpush.msrb.mxu0 %v2389_v13  ;;  %v1874_v13 = vld [vmem:[%s2940_s3 + $0x38] sm:$0xff] }
 0x20a   :  { %1072 = vmatpush.msrb.mxu2 %v1874_v13 }
 0x20c   :  { %1073 = vmatpush.msrb.mxu2 %v1875_v20 }
 0x20e   :  { %1643 = vmatmul.msk.f32.gmra.mxu0 %vm99_vm1, %v2047_v17 }
 0x216   :  { %1644 = vmatmul.msk.f32.gmra.mxu0 %vm99_vm1, %v2061_v19 }
 0x255   :  { %v770_v51 = vpop.f32.mrf.mxu1 }
 0x256   :  { %v771_v57 = vadd.f32 %v2514_v21, %v770_v51 }
 0x258   :  { %v776_v2 = vmax.f32 %v771_v57, 0.0 }
 0x25a   :  { %1638 = vmatmul.msk.f32.vlgmr.msra.gmra.mxu2 %vm489_vm8, %v776_v2 }
 0x25b   :  { %1352 = vmatpush.msra.mxu2 %v1873_v58 }
 0x25d   :  { %1353 = vmatpush.msra.mxu2 %v1874_v13 }
 0x25f   :  { %1354 = vmatpush.msra.mxu2 %v1875_v20 }
 0x27b   :  { %v721_v63 = vpop.f32.mrf.mxu0 }
 0x27c   :  { %v722_v30 = vadd.f32 %v721_v63, %v2521_v62 }
 0x27e   :  { %v740_v42 = vadd.f32 %v738_v14, %v722_v30 }
 0x280   :  { %v742_v49 = vmax.f32 %v740_v42, 0.0 }
 0x282   :  { %1637 = vmatmul.msk.f32.gmra.mxu1 %vm746_vm9, %v742_v49 }
 0x283   :  { %v865_v43 = vpop.f32.mrf.mxu0 }
 0x28a   :  { %1650 = vmatmul.msk.f32.vlgmr.msrb.gmra.mxu1 %vm99_vm1, %v2031_v15 }
 0x28b   :  { %1484 = vmatpush.msrb.mxu1 %v2438_v45  ;;  %v1876_v45 = vld [vmem:[%s2940_s3 + $0x58] sm:$0xff]  ;;  %v868_v36 = vpop.f32.mrf.mxu0 }
 0x28c   :  { %1104 = vmatpush.msrb.mxu3 %v1876_v45 }
 0x28d   :  { %1485 = vmatpush.msrb.mxu1 %v2444_v0  ;;  %v1877_v0 = vld [vmem:[%s2940_s3 + $0x50] sm:$0xff] }
 0x28e   :  { %1105 = vmatpush.msrb.mxu3 %v1877_v0 }
 0x28f   :  { %1486 = vmatpush.msrb.mxu1 %v2450_v38  ;;  %v1878_v38 = vld [vmem:[%s2940_s3 + $0x48] sm:$0xff] }
 0x290   :  { %1106 = vmatpush.msrb.mxu3 %v1878_v38 }
 0x291   :  { %1487 = vmatpush.msrb.mxu1 %v2456_v27  ;;  %v2551_v27 = vld [vmem:[%s2949_s10] ss:$0 sm:$0xff] }
 0x292   :  { %1651 = vmatmul.msk.f32.gmra.mxu1 %vm99_vm1, %v2047_v17 }
 0x293   :  { %v871_v35 = vpop.f32.mrf.mxu0 }
 0x29a   :  { %1652 = vmatmul.msk.f32.gmra.mxu1 %vm99_vm1, %v2061_v19 }
 0x2dd   :  { %v804_v28 = vpop.f32.mrf.mxu2 }
 0x2de   :  { %v805_v16 = vadd.f32 %v2551_v27, %v804_v28 }
 0x2e0   :  { %v810_v24 = vmax.f32 %v805_v16, 0.0  ;;  %v844_v34 = vsel %vm91_vm0, %v805_v16, 0.0 }
 0x2e1   :  { %1645 = vmatmul.msk.f32.gmra.mxu0 %vm99_vm1, %v844_v34  ;;  %1653 = vmatmul.msk.f32.gmra.mxu1 %vm99_vm1, %v844_v34 }
 0x2e2   :  { %1640 = vmatmul.msk.f32.vlgmr.msra.gmra.mxu3 %vm91_vm0, %v810_v24 }
 0x2e3   :  { %1379 = vmatpush.msra.mxu3 %v1876_v45 }
 0x2e5   :  { %1380 = vmatpush.msra.mxu3 %v1877_v0 }
 0x2e7   :  { %1381 = vmatpush.msra.mxu3 %v1878_v38 }
 0x2ff   :  { %v773_v5 = vpop.f32.mrf.mxu1 }
 0x300   :  { %v774_v39 = vadd.f32 %v2514_v21, %v773_v5 }
 0x302   :  { %v777_v1 = vmax.f32 %v774_v39, 0.0 }
 0x304   :  { %1639 = vmatmul.msk.f32.gmra.mxu2 %vm489_vm8, %v777_v1 }
 0x307   :  { %v970_v7 = vpop.f32.mrf.mxu1 }
 0x30c   :  { %1658 = vmatmul.msk.f32.vlgmr.msrb.gmra.mxu2 %vm99_vm1, %v2031_v15 }
 0x30d   :  { %1517 = vmatpush.msrb.mxu2 %v77_v53 }
 0x30f   :  { %1518 = vmatpush.msrb.mxu2 %v76_v60  ;;  %v973_v18 = vpop.f32.mrf.mxu1 }
 0x310   :  { %v974_v8 = vadd.f32 %v2585_v26, %v973_v18  ;;  %v2652_v18 = vld [vmem:[%s2942_s4 + $0x3] ss:$0 sm:$0xff] }
 0x312   :  { %v1655_v41 = vmul.f32 -1.442695, %v974_v8 }
 0x314   :  { %1659 = vmatmul.msk.f32.gmra.mxu2 %vm99_vm1, %v2047_v17 }
 0x317   :  { %v976_v44 = vpop.f32.mrf.mxu1 }
 0x318   :  { %v977_v6 = vadd.f32 %v2585_v26, %v976_v44 }
 0x31a   :  { %v1656_v47 = vmul.f32 -1.442695, %v977_v6 }
 0x31c   :  { %1660 = vmatmul.msk.f32.gmra.mxu2 %vm99_vm1, %v2061_v19 }
 0x324   :  { %1661 = vmatmul.msk.f32.gmra.mxu2 %vm99_vm1, %v844_v34 }
 0x35e   :  { %v874_v25 = vpop.f32.mrf.mxu0  ;;  %v979_v12 = vpop.f32.mrf.mxu1 }
 0x35f   :  { %v980_v60 = vadd.f32 %v2585_v26, %v979_v12 }
 0x361   :  { %v1657_v57 = vmul.f32 -1.442695, %v980_v60 }
 0x365   :  { %v2604_v11 = vpop.f32.mrf.mxu3 }
 0x387   :  { %v807_v4 = vpop.f32.mrf.mxu2 }
 0x388   :  { %v2571_v9 = vadd.f32 %v2551_v27, %v807_v4 }
 0x38a   :  { %v811_v23 = vmax.f32 %v2571_v9, 0.0 }
 0x38c   :  { %1641 = vmatmul.msk.f32.gmra.mxu3 %vm91_vm0, %v811_v23 }
 0x38f   :  { %v1075_v49 = vpop.f32.mrf.mxu2 }
 0x394   :  { %1662 = vmatmul.msk.f32.vlgmr.msrb.gmra.mxu3 %vm99_vm1, %v2031_v15  ;;  %v971_v15 = vadd.f32 %v2585_v26, %v970_v7 }
 0x395   :  { %1549 = vmatpush.msrb.mxu3 %v79_v55 }
 0x396   :  { %v1654_v32 = vmul.f32 -1.442695, %v971_v15 }
 0x398   :  { %1793 = vpow2.f32 %v1654_v32 }
 0x39c   :  { %1663 = vmatmul.msk.f32.gmra.mxu3 %vm99_vm1, %v2047_v17  ;;  %v2591_v17 = vld [vmem:[%s2942_s4] ss:$0 sm:$0xff] }
 0x39d   :  { %v869_v37 = vadd.f32 %v2591_v17, %v868_v36  ;;  %v872_v33 = vadd.f32 %v2591_v17, %v871_v35  ;;  %v875_v10 = vadd.f32 %v2591_v17, %v874_v25  ;;  %v2668_v35 = vld [vmem:[%s2942_s4 + $0x2] ss:$0 sm:$0xff] }
 0x39e   :  { %v1794_v52 = vpop.eup %1793 }
 0x39f   :  { %v1647_v3 = vmul.f32 -1.442695, %v869_v37  ;;  %v1648_v46 = vmul.f32 -1.442695, %v872_v33  ;;  %v2598_v50 = vadd.f32 1.0, %v1794_v52  ;;  %v1076_v33 = vadd.f32 %v2668_v35, %v1075_v49 }
 0x3a0   :  { %v1649_v20 = vmul.f32 -1.442695, %v875_v10 }
 0x3a1   :  { %v1009_v0 = vand.u32 2147483648, %v2598_v50  ;;  %vm1003_vm11 = vweird.f32 %v2598_v50  ;;  %v1007_v52 = vand.u32 2147483647, %v2598_v50 }
 0x3a3   :  { %v1010_v1 = vor.u32 1.1754944e-38, %v1009_v0  ;;  %vm1008_vm5 = vcmp.eq.f32.partialorder %v1007_v52, 8.507059e+37 }
 0x3a4   :  { %1664 = vmatmul.msk.f32.gmra.mxu3 %vm99_vm1, %v2061_v19  ;;  %v866_v19 = vadd.f32 %v2591_v17, %v865_v43 }
 0x3a6   :  { %v1646_v22 = vmul.f32 -1.442695, %v866_v19 }
 0x3a8   :  { %1795 = vpow2.f32 %v1646_v22 }
 0x3a9   :  { %1797 = vpow2.f32 %v1655_v41 }
 0x3aa   :  { %1799 = vpow2.f32 %v1647_v3  ;;  %v1078_v3 = vpop.f32.mrf.mxu2 }
 0x3ab   :  { %1801 = vpow2.f32 %v1648_v46 }
 0x3ac   :  { %1665 = vmatmul.msk.f32.gmra.mxu3 %vm99_vm1, %v844_v34  ;;  %1803 = vpow2.f32 %v1656_v47 }
 0x3ad   :  { %1805 = vrcp.f32 %v2598_v50 }
 0x3ae   :  { %v1796_v48 = vpop.eup %1795 }
 0x3af   :  { %v2600_v59 = vadd.f32 1.0, %v1796_v48  ;;  %v1798_v40 = vpop.eup %1797 }
 0x3b0   :  { %v1800_v54 = vpop.eup %1799  ;;  %v2607_v53 = vadd.f32 1.0, %v1798_v40 }
 0x3b1   :  { %v1802_v56 = vpop.eup %1801  ;;  %1807 = vrcp.f32 %v2600_v59  ;;  %v2610_v58 = vadd.f32 1.0, %v1800_v54  ;;  %vm898_vm10 = vweird.f32 %v2600_v59  ;;  %v904_v44 = vand.u32 2147483648, %v2600_v59 }
 0x3b2   :  { %v1804_v13 = vpop.eup %1803  ;;  %v2612_v51 = vadd.f32 1.0, %v1802_v56  ;;  %1809 = vrcp.f32 %v2607_v53  ;;  %v1024_v31 = vand.u32 2147483648, %v2607_v53  ;;  %v902_v25 = vand.u32 2147483647, %v2600_v59 }
 0x3b3   :  { %v2615_v2 = vpop.eup %1805  ;;  %1811 = vrcp.f32 %v2610_v58  ;;  %v2618_v29 = vadd.f32 1.0, %v1804_v13  ;;  %vm1018_vm15 = vweird.f32 %v2607_v53  ;;  %v905_v60 = vor.u32 1.1754944e-38, %v904_v44 }
 0x3b4   :  { %1813 = vpow2.f32 %v1649_v20  ;;  %v999_v30 = vmul.f32 %v2615_v2, %v2598_v50  ;;  %vm1004_vm12 = vweird.f32 %v2615_v2  ;;  %v1025_v12 = vor.u32 1.1754944e-38, %v1024_v31 }
 0x3b5   :  { %1815 = vrcp.f32 %v2612_v51  ;;  %v1039_v36 = vand.u32 2147483648, %v2618_v29  ;;  %vm2685_vm14 = vmor %vm1003_vm11, %vm1004_vm12  ;;  %vm1033_vm4 = vweird.f32 %v2618_v29  ;;  %vm2713_vm6 = vcmp.eq.f32.partialorder %v902_v25, 8.507059e+37 }
 0x3b6   :  { %1817 = vpow2.f32 %v1657_v57  ;;  %v1000_v28 = vsub.f32 1.0, %v999_v30  ;;  %vm913_vm7 = vweird.f32 %v2610_v58  ;;  %v917_v31 = vand.u32 2147483647, %v2610_v58 }
 0x3b7   :  { %v2620_v63 = vpop.eup %1807  ;;  %1819 = vrcp.f32 %v2618_v29  ;;  %v2690_v54 = vor.u32 1.1754944e-38, %v1039_v36  ;;  %v934_v25 = vand.u32 2147483648, %v2612_v51 }
 0x3b8   :  { %v894_v42 = vmul.f32 %v2620_v63, %v2600_v59  ;;  %v2630_v55 = vpop.eup %1809  ;;  %v1001_v43 = vmul.f32 %v2615_v2, %v1000_v28  ;;  %vm899_vm13 = vweird.f32 %v2620_v63 }
 0x3b9   :  { %v2632_v45 = vpop.eup %1811  ;;  %v1014_v34 = vmul.f32 %v2630_v55, %v2607_v53  ;;  %vm2696_vm2 = vmor %vm898_vm10, %vm899_vm13  ;;  %vm1019_vm3 = vweird.f32 %v2630_v55 }
 0x3ba   :  { %v1814_v38 = vpop.eup %1813  ;;  %v895_v24 = vsub.f32 1.0, %v894_v42  ;;  %v909_v7 = vmul.f32 %v2632_v45, %v2610_v58  ;;  %v1002_v46 = vadd.f32 %v2615_v2, %v1001_v43  ;;  %vm914_vm11 = vweird.f32 %v2632_v45  ;;  %vm2725_vm12 = vmor %vm1018_vm15, %vm1019_vm3 }
 0x3bb   :  { %v2635_v16 = vpop.eup %1815  ;;  %v2643_v4 = vadd.f32 1.0, %v1814_v38  ;;  %v1015_v19 = vsub.f32 1.0, %v1014_v34  ;;  %v1022_v38 = vand.u32 2147483647, %v2607_v53  ;;  %vm2745_vm10 = vmor %vm913_vm7, %vm914_vm11 }
 0x3bc   :  { %v1818_v5 = vpop.eup %1817  ;;  %v2657_v32 = vmul.f32 %v2635_v16, %v2612_v51  ;;  %v896_v8 = vmul.f32 %v2620_v63, %v895_v24  ;;  %v910_v6 = vsub.f32 1.0, %v909_v7  ;;  %v1006_v20 = vsel %vm2685_vm14, %v2615_v2, %v1002_v46 }
 0x3bd   :  { %v2639_v39 = vpop.eup %1819  ;;  %v2659_v22 = vadd.f32 1.0, %v1818_v5  ;;  %1821 = vrcp.f32 %v2643_v4  ;;  %v1016_v47 = vmul.f32 %v2630_v55, %v1015_v19  ;;  %v1011_v5 = vsel %vm1008_vm5, %v1010_v1, %v1006_v20 }
 0x3be   :  { %v1029_v37 = vmul.f32 %v2639_v39, %v2618_v29  ;;  %v897_v48 = vadd.f32 %v2620_v63, %v896_v8  ;;  %v925_v50 = vsub.f32 1.0, %v2657_v32  ;;  %v911_v59 = vmul.f32 %v2632_v45, %v910_v6  ;;  %v1081_v8 = vpop.f32.mrf.mxu2 }
 0x3bf   :  { %v1017_v0 = vadd.f32 %v2630_v55, %v1016_v47  ;;  %v1054_v19 = vand.u32 2147483648, %v2659_v22  ;;  %vm1023_vm13 = vcmp.eq.f32.partialorder %v1022_v38, 8.507059e+37  ;;  %vm2757_vm14 = vcmp.eq.f32.partialorder %v917_v31, 8.507059e+37 }
 0x3c0   :  { %v1030_v56 = vsub.f32 1.0, %v1029_v37  ;;  %v901_v42 = vsel %vm2696_vm2, %v2620_v63, %v897_v48  ;;  %v1079_v63 = vadd.f32 %v2668_v35, %v1078_v3  ;;  %vm1034_vm15 = vweird.f32 %v2639_v39 }
 0x3c1   :  { %v906_v53 = vsel %vm2713_vm6, %v905_v60, %v901_v42  ;;  %v1021_v32 = vsel %vm2725_vm12, %v2630_v55, %v1017_v0  ;;  %v926_v55 = vmul.f32 %v2635_v16, %v925_v50  ;;  %vm928_vm2 = vweird.f32 %v2612_v51  ;;  %vm2779_vm5 = vmor %vm1033_vm4, %vm1034_vm15 }
 0x3c2   :  { %v1031_v36 = vmul.f32 %v2639_v39, %v1030_v56  ;;  %v1026_v52 = vsel %vm1023_vm13, %v1025_v12, %v1021_v32  ;;  %vm929_vm3 = vweird.f32 %v2635_v16  ;;  %v932_v48 = vand.u32 2147483647, %v2612_v51 }
 0x3c3   :  { %v2708_v30 = vpop.eup %1821  ;;  %v1037_v50 = vand.u32 2147483647, %v2618_v29  ;;  %v927_v20 = vadd.f32 %v2635_v16, %v926_v55  ;;  %vm2791_vm6 = vmor %vm928_vm2, %vm929_vm3  ;;  %vm943_vm11 = vweird.f32 %v2643_v4 }
 0x3c4   :  { %v939_v37 = vmul.f32 %v2708_v30, %v2643_v4  ;;  %v1032_v10 = vadd.f32 %v2639_v39, %v1031_v36  ;;  %vm2796_vm4 = vcmp.eq.f32.partialorder %v932_v48, 8.507059e+37 }
 0x3c5   :  { %vm1038_vm7 = vcmp.eq.f32.partialorder %v1037_v50, 8.507059e+37  ;;  %v931_v31 = vsel %vm2791_vm6, %v2635_v16, %v927_v20  ;;  %v1885_v20 = vld [vmem:[%s2941_s0 + $0x30] sm:$0xff] }
 0x3c6   :  { %v940_v60 = vsub.f32 1.0, %v939_v37 }
 0x40f   :  { %v2623_v14 = vpop.f32.mrf.mxu3 }
 0x417   :  { %v1108_v23 = vpop.f32.mrf.mxu3 }
 0x418   :  { %v1109_v15 = vadd.f32 %v2652_v18, %v1108_v23  ;;  %v919_v23 = vand.u32 2147483648, %v2610_v58 }
 0x41a   :  { %v1666_v41 = vmul.f32 -1.442695, %v1109_v15  ;;  %v912_v15 = vadd.f32 %v2632_v45, %v911_v59  ;;  %v920_v3 = vor.u32 1.1754944e-38, %v919_v23  ;;  %v1084_v23 = vpop.f32.mrf.mxu2  ;;  %v947_v59 = vand.u32 2147483647, %v2643_v4 }
 0x41b   :  { %v1085_v37 = vadd.f32 %v2668_v35, %v1084_v23 }
 0x41c   :  { %1823 = vpow2.f32 %v1666_v41  ;;  %v1196_v41 = vmul.f32 0.0, %v1011_v5  ;;  %v916_v46 = vsel %vm2745_vm10, %v2632_v45, %v912_v15  ;;  %v1082_v45 = vadd.f32 %v2668_v35, %v1081_v8 }
 0x41d   :  { %1825 = vrcp.f32 %v2659_v22  ;;  %v921_v0 = vsel %vm2757_vm14, %v920_v3, %v916_v46  ;;  %v941_v8 = vmul.f32 %v2708_v30, %v940_v60  ;;  %vm944_vm10 = vweird.f32 %v2708_v30 }
 0x41e   :  { %1827 = vtanh.f32 %v1076_v33  ;;  %vm2836_vm6 = vmor %vm943_vm11, %vm944_vm10  ;;  %vm948_vm10 = vcmp.eq.f32.partialorder %v947_v59, 8.507059e+37 }
 0x41f   :  { %v1111_v13 = vpop.f32.mrf.mxu3  ;;  %v942_v48 = vadd.f32 %v2708_v30, %v941_v8 }
 0x420   :  { %v1112_v57 = vadd.f32 %v2652_v18, %v1111_v13 }
 0x421   :  { %v946_v38 = vsel %vm2836_vm6, %v2708_v30, %v942_v48 }
 0x422   :  { %v1824_v2 = vpop.eup %1823  ;;  %v1667_v24 = vmul.f32 -1.442695, %v1112_v57 }
 0x423   :  { %v2730_v34 = vpop.eup %1825  ;;  %v2734_v43 = vadd.f32 1.0, %v1824_v2  ;;  %v1197_v2 = vmul.f32 0.0, %v1026_v52 }
 0x424   :  { %v1828_v7 = vpop.eup %1827  ;;  %1829 = vpow2.f32 %v1667_v24  ;;  %v1044_v33 = vmul.f32 %v2730_v34, %v2659_v22  ;;  %v1036_v24 = vsel %vm2779_vm5, %v2639_v39, %v1032_v10  ;;  %vm1049_vm2 = vweird.f32 %v2730_v34 }
 0x425   :  { %1831 = vrcp.f32 %v2734_v43  ;;  %v1200_v58 = vmul.f32 %v1828_v7, %v906_v53  ;;  %v1147_v36 = vand.u32 2147483648, %v2734_v43  ;;  %v1145_v39 = vand.u32 2147483647, %v2734_v43 }
 0x426   :  { %1833 = vtanh.f32 %v1079_v63  ;;  %v1045_v49 = vsub.f32 1.0, %v1044_v33  ;;  %v935_v63 = vor.u32 1.1754944e-38, %v934_v25  ;;  %v1041_v32 = vsel %vm1038_vm7, %v2690_v54, %v1036_v24 }
 0x427   :  { %v1114_v6 = vpop.f32.mrf.mxu3  ;;  %v1204_v13 = vadd.f32 %v1200_v58, %v1196_v41  ;;  %vm1141_vm13 = vweird.f32 %v2734_v43  ;;  %v1148_v54 = vor.u32 1.1754944e-38, %v1147_v36  ;;  %vm1146_vm15 = vcmp.eq.f32.partialorder %v1145_v39, 8.507059e+37 }
 0x428   :  { %v1115_v47 = vadd.f32 %v2652_v18, %v1114_v6  ;;  %v1046_v1 = vmul.f32 %v2730_v34, %v1045_v49  ;;  %v936_v3 = vsel %vm2796_vm4, %v935_v63, %v931_v31  ;;  %v1198_v50 = vmul.f32 0.0, %v1041_v32 }
 0x429   :  { %vm1048_vm5 = vweird.f32 %v2659_v22 }
 0x42a   :  { %v1830_v40 = vpop.eup %1829  ;;  %v1668_v12 = vmul.f32 -1.442695, %v1115_v47  ;;  %v1047_v25 = vadd.f32 %v2730_v34, %v1046_v1  ;;  %vm2849_vm4 = vmor %vm1048_vm5, %vm1049_vm2 }
 0x42b   :  { %v1832_v56 = vpop.eup %1831  ;;  %v2783_v57 = vadd.f32 1.0, %v1830_v40 }
 0x42c   :  { %v1834_v42 = vpop.eup %1833  ;;  %v1137_v29 = vmul.f32 %v1832_v56, %v2734_v43  ;;  %1835 = vpow2.f32 %v1668_v12  ;;  %vm1142_vm12 = vweird.f32 %v1832_v56 }
 0x42d   :  { %1837 = vrcp.f32 %v2783_v57  ;;  %v1201_v5 = vmul.f32 %v1834_v42, %v921_v0  ;;  %vm1143_vm14 = vmor %vm1141_vm13, %vm1142_vm12  ;;  %v1162_v12 = vand.u32 2147483648, %v2783_v57  ;;  %v1052_v42 = vand.u32 2147483647, %v2659_v22 }
 0x42e   :  { %1839 = vtanh.f32 %v1082_v45  ;;  %v1138_v51 = vsub.f32 1.0, %v1137_v29  ;;  %v1055_v0 = vor.u32 1.1754944e-38, %v1054_v19  ;;  %vm1156_vm7 = vweird.f32 %v2783_v57 }
 0x42f   :  { %1841 = vtanh.f32 %v1204_v13  ;;  %v1117_v7 = vpop.f32.mrf.mxu3  ;;  %v1205_v44 = vadd.f32 %v1201_v5, %v1197_v2  ;;  %v1160_v13 = vand.u32 2147483647, %v2783_v57  ;;  %v1051_v22 = vsel %vm2849_vm4, %v2730_v34, %v1047_v25 }
 0x430   :  { %v1118_v53 = vadd.f32 %v2652_v18, %v1117_v7  ;;  %v1139_v15 = vmul.f32 %v1832_v56, %v1138_v51  ;;  %v1163_v63 = vor.u32 1.1754944e-38, %v1162_v12  ;;  %vm1053_vm13 = vcmp.eq.f32.partialorder %v1052_v42, 8.507059e+37 }
 0x431   :  { %vm1161_vm12 = vcmp.eq.f32.partialorder %v1160_v13, 8.507059e+37  ;;  %v1056_v7 = vsel %vm1053_vm13, %v1055_v0, %v1051_v22 }
 0x432   :  { %v1836_v16 = vpop.eup %1835  ;;  %v1669_v33 = vmul.f32 -1.442695, %v1118_v53  ;;  %v1140_v41 = vadd.f32 %v1832_v56, %v1139_v15  ;;  %v1199_v32 = vmul.f32 0.0, %v1056_v7 }
 0x433   :  { %v1838_v58 = vpop.eup %1837  ;;  %v2819_v55 = vadd.f32 1.0, %v1836_v16 }
 0x434   :  { %v1840_v6 = vpop.eup %1839  ;;  %v1152_v46 = vmul.f32 %v1838_v58, %v2783_v57  ;;  %1843 = vpow2.f32 %v1669_v33  ;;  %v1144_v52 = vsel %vm1143_vm14, %v1832_v56, %v1140_v41  ;;  %v949_v56 = vand.u32 2147483648, %v2643_v4 }
 0x435   :  { %v1842_v47 = vpop.eup %1841  ;;  %1845 = vrcp.f32 %v2819_v55  ;;  %v1149_v43 = vsel %vm1146_vm15, %v1148_v54, %v1144_v52  ;;  %v1202_v45 = vmul.f32 %v1840_v6, %v936_v3  ;;  %vm1157_vm3 = vweird.f32 %v1838_v58 }
 0x436   :  { %1847 = vtanh.f32 %v1085_v37  ;;  %v1212_v40 = vmul.f32 %v1842_v47, %v1149_v43  ;;  %v1153_v10 = vsub.f32 1.0, %v1152_v46  ;;  %vm1158_vm11 = vmor %vm1156_vm7, %vm1157_vm3  ;;  %v950_v24 = vor.u32 1.1754944e-38, %v949_v56 }
 0x437   :  { %1849 = vtanh.f32 %v1205_v44  ;;  %v1206_v28 = vadd.f32 %v1202_v45, %v1198_v50  ;;  %v1177_v15 = vand.u32 2147483648, %v2819_v55  ;;  %v1175_v1 = vand.u32 2147483647, %v2819_v55  ;;  %v1883_v45 = vld [vmem:[%s2941_s0 + $0x28] sm:$0xff] }
 0x438   :  { %1221 = vrot.lane.b32.xlu0 %v1212_v40, %s1889_s14  ;;  %v1154_v60 = vmul.f32 %v1838_v58, %v1153_v10  ;;  %v951_v23 = vsel %vm948_vm10, %v950_v24, %v946_v38  ;;  %vm1171_vm15 = vweird.f32 %v2819_v55  ;;  %v1891_v56 = vmov 1  }
 0x439   :  { %v1178_v33 = vor.u32 1.1754944e-38, %v1177_v15  ;;  %vm1176_vm3 = vcmp.eq.f32.partialorder %v1175_v1, 8.507059e+37  ;;  %1702 = vset.pattern.permute.xlu1 %v1891_v56  ;;  %1703 = vset.pattern.permute.xlu2 %v1891_v56  ;;  %v2909_v1 = vld [vmem:[%s2945_s6] ss:$0 sm:$0xff] }
 0x43a   :  { %v1844_v49 = vpop.eup %1843  ;;  %v1155_v2 = vadd.f32 %v1838_v58, %v1154_v60  ;;  %v1884_v60 = vld [vmem:[%s2944_s2] sm:$0xff]  ;;  %1704 = vset.pattern.permute.xlu0 %v1891_v56 }
 0x43b   :  { %v1846_v4 = vpop.eup %1845  ;;  %v1135_v19 = vadd.f32 1.0, %v1844_v49 }
 0x43c   :  { %v1848_v30 = vpop.eup %1847  ;;  %v1167_v51 = vmul.f32 %v1846_v4, %v2819_v55  ;;  %v1159_v5 = vsel %vm1158_vm11, %v1838_v58, %v1155_v2  ;;  %vm1172_vm14 = vweird.f32 %v1846_v4 }
 0x43d   :  { %v1850_v31 = vpop.eup %1849  ;;  %1851 = vrcp.f32 %v1135_v19  ;;  %v1164_v57 = vsel %vm1161_vm12, %v1163_v63, %v1159_v5  ;;  %v1203_v34 = vmul.f32 %v1848_v30, %v951_v23  ;;  %vm1173_vm2 = vmor %vm1171_vm15, %vm1172_vm14  ;;  %v1192_v46 = vand.u32 2147483648, %v1135_v19 }
 0x43e   :  { %v1213_v36 = vmul.f32 %v1850_v31, %v1164_v57  ;;  %v1168_v53 = vsub.f32 1.0, %v1167_v51  ;;  %1853 = vtanh.f32 %v1206_v28  ;;  %v1190_v55 = vand.u32 2147483647, %v1135_v19 }
 0x43f   :  { %v2863_v37 = vadd.f32 %v1203_v34, %v1199_v32  ;;  %vm1186_vm6 = vweird.f32 %v1135_v19  ;;  %v1193_v48 = vor.u32 1.1754944e-38, %v1192_v46 }
 0x440   :  { %1223 = vrot.lane.b32.xlu1 %v1213_v36, %s1889_s14  ;;  %v1169_v39 = vmul.f32 %v1846_v4, %v1168_v53  ;;  %vm1191_vm7 = vcmp.eq.f32.partialorder %v1190_v55, 8.507059e+37 }
 0x441   :  { %1855 = vtanh.f32 %v2863_v37 }
 0x442   :  { %v1170_v8 = vadd.f32 %v1846_v4, %v1169_v39 }
 0x443   :  { %v1852_v16 = vpop.eup %1851 }
 0x444   :  { %v1182_v41 = vmul.f32 %v1852_v16, %v1135_v19  ;;  %v1174_v58 = vsel %vm1173_vm2, %v1846_v4, %v1170_v8  ;;  %v1854_v44 = vpop.eup %1853  ;;  %vm1187_vm5 = vweird.f32 %v1852_v16 }
 0x445   :  { %v1179_v3 = vsel %vm1176_vm3, %v1178_v33, %v1174_v58  ;;  %vm1188_vm4 = vmor %vm1186_vm6, %vm1187_vm5 }
 0x446   :  { %v1214_v54 = vmul.f32 %v1854_v44, %v1179_v3  ;;  %v1183_v6 = vsub.f32 1.0, %v1182_v41 }
 0x447   :  { %v1856_v25 = vpop.eup %1855 }
 0x448   :  { %1225 = vrot.lane.b32.xlu2 %v1214_v54, %s1889_s14  ;;  %v1184_v52 = vmul.f32 %v1852_v16, %v1183_v6  ;;  %1452 = vperm.xlu1 %1702, %v1884_v60  }
 0x44a   :  { %v1185_v47 = vadd.f32 %v1852_v16, %v1184_v52 }
 0x44c   :  { %v1189_v43 = vsel %vm1188_vm4, %v1852_v16, %v1185_v47 }
 0x44d   :  { %v1194_v40 = vsel %vm1191_vm7, %v1193_v48, %v1189_v43  ;;  %vm1568_vm7 = vcmask 15360  }
 0x44e   :  { %v1215_v10 = vmul.f32 %v1856_v25, %v1194_v40 }
 0x450   :  { %1216 = vst.msk [vmem:[#allocation2] sm:$0xff] %vm489_vm8, %v1215_v10  ;;  %1227 = vrot.lane.b32.xlu0 %v1215_v10, %s1889_s14  ;;  %1457 = vperm.xlu2 %1703, %v2482_v61   ;;  %v1886_v61 = vld [vmem:[%s2941_s0 + $0x38] sm:$0xff] }
 0x457   :  { %v1417_v29 = vld [vmem:[#allocation2] sm:$0xff] }
 0x4a2   :  { %v1226_v42 = vpop.permute.xlu2 %1225 }
 0x4a3   :  { %v1235_v49 = vsel %vm91_vm0, %v1886_v61, %v1226_v42 }
 0x4aa   :  { %v1222_v50 = vpop.permute.xlu0 %1221 }
 0x4ab   :  { %v1233_v12 = vsel %vm91_vm0, %v1883_v45, %v1222_v50 }
 0x4ac   :  { %1670 = vmatmul.msk.f32.vlgmr.msra.gmra.mxu0 %vm99_vm1, %v1233_v12  ;;  %1675 = vmatmul.msk.f32.vlgmr.msra.gmra.mxu1 %vm99_vm1, %v1233_v12 }
 0x4ad   :  { %1680 = vmatmul.msk.f32.vlgmr.msra.gmra.mxu2 %vm99_vm1, %v1233_v12  ;;  %1684 = vmatmul.msk.f32.vlgmr.msra.gmra.mxu3 %vm99_vm1, %v1233_v12 }
 0x4b2   :  { %v1224_v13 = vpop.permute.xlu1 %1223 }
 0x4b3   :  { %v1234_v59 = vsel %vm91_vm0, %v1885_v20, %v1224_v13 }
 0x4b4   :  { %1671 = vmatmul.msk.f32.gmra.mxu0 %vm99_vm1, %v1234_v59  ;;  %1676 = vmatmul.msk.f32.gmra.mxu1 %vm99_vm1, %v1234_v59 }
 0x4b5   :  { %1681 = vmatmul.msk.f32.gmra.mxu2 %vm99_vm1, %v1234_v59  ;;  %1685 = vmatmul.msk.f32.gmra.mxu3 %vm99_vm1, %v1234_v59 }
 0x4ba   :  { %v1453_v15 = vpop.permute.xlu1 %1452 }
 0x4bb   :  { %v1460_v32 = vmul.f32 %v2909_v1, %v1453_v15  ;;  %v1458_v15 = vpop.permute.xlu2 %1457 }
 0x4bc   :  { %1672 = vmatmul.msk.f32.gmra.mxu0 %vm99_vm1, %v1235_v49  ;;  %1677 = vmatmul.msk.f32.gmra.mxu1 %vm99_vm1, %v1235_v49 }
 0x4bd   :  { %1682 = vmatmul.msk.f32.gmra.mxu2 %vm99_vm1, %v1235_v49  ;;  %1686 = vmatmul.msk.f32.gmra.mxu3 %vm99_vm1, %v1235_v49 }
 0x4c2   :  { %v1228_v0 = vpop.permute.xlu0 %1227 }
 0x4c3   :  { %v1236_v38 = vsel %vm91_vm0, %v2571_v9, %v1228_v0 }
 0x4c4   :  { %1673 = vmatmul.msk.f32.gmra.mxu0 %vm99_vm1, %v1236_v38  ;;  %1678 = vmatmul.msk.f32.gmra.mxu1 %vm99_vm1, %v1236_v38 }
 0x4c5   :  { %1683 = vmatmul.msk.f32.gmra.mxu2 %vm99_vm1, %v1236_v38  ;;  %1687 = vmatmul.msk.f32.gmra.mxu3 %vm99_vm1, %v1236_v38 }
 0x4cc   :  { %1689 = vmatmul.msk.f32.vlgmr.msrb.gmra.mxu0 %vm489_vm8, %v1417_v29 }
 0x529   :  { %v1266_v2 = vpop.f32.mrf.mxu0  ;;  %v1311_v4 = vpop.f32.mrf.mxu1 }
 0x530   :  { %v1356_v28 = vpop.f32.mrf.mxu2  ;;  %v1383_v22 = vpop.f32.mrf.mxu3 }
 0x531   :  { %v1268_v19 = vpop.f32.mrf.mxu0  ;;  %v1313_v63 = vpop.f32.mrf.mxu1 }
 0x538   :  { %v1358_v30 = vpop.f32.mrf.mxu2  ;;  %v1385_v24 = vpop.f32.mrf.mxu3 }
 0x539   :  { %v1270_v9 = vpop.f32.mrf.mxu0  ;;  %v1315_v51 = vpop.f32.mrf.mxu1 }
 0x540   :  { %v1360_v5 = vpop.f32.mrf.mxu2  ;;  %v1387_v31 = vpop.f32.mrf.mxu3 }
 0x541   :  { %v1272_v57 = vpop.f32.mrf.mxu0  ;;  %v1317_v23 = vpop.f32.mrf.mxu1 }
 0x542   :  { %v1273_v7 = vadd.f32 %v2591_v17, %v1272_v57  ;;  %v1318_v36 = vadd.f32 %v2585_v26, %v1317_v23  ;;  %v1888_v26 = vld [vmem:[%s2948_s1] sm:$0xff]  ;;  %s1892_s1 = smov 1  }
 0x544   :  { %v1674_v53 = vmul.f32 -1.442695, %v1273_v7  ;;  %v1679_v34 = vmul.f32 -1.442695, %v1318_v36 }
 0x546   :  { %1857 = vpow2.f32 %v1674_v53 }
 0x547   :  { %1859 = vpow2.f32 %v1679_v34 }
 0x548   :  { %v1389_v39 = vpop.f32.mrf.mxu3  ;;  %v1362_v46 = vpop.f32.mrf.mxu2 }
 0x549   :  { %v1390_v8 = vadd.f32 %v2652_v18, %v1389_v39  ;;  %v1444_v16 = vpop.f32.mrf.mxu0  ;;  %v1363_v47 = vadd.f32 %v2668_v35, %v1362_v46  ;;  %v1461_v39 = vmul.f32 %v2909_v1, %v1458_v15  ;;  %v1712_v1 = vld [vmem:[#allocation3] ss:$0 sm:$0xff] }
 0x54a   :  { %v1445_v17 = vadd.f32 %v1888_v26, %v1444_v16 }
 0x54b   :  { %v1688_v33 = vmul.f32 -1.442695, %v1390_v8 }
 0x54c   :  { %v1858_v41 = vpop.eup %1857  ;;  %v1462_v58 = vadd.f32 %v1460_v32, %v1445_v17 }
 0x54d   :  { %v1860_v44 = vpop.eup %1859  ;;  %v1278_v3 = vadd.f32 1.0, %v1858_v41  ;;  %1861 = vpow2.f32 %v1688_v33 }
 0x54e   :  { %v1323_v54 = vadd.f32 1.0, %v1860_v44  ;;  %v1464_v6 = vmax.f32 %v1462_v58, 0.0 }
 0x54f   :  { %1863 = vrcp.f32 %v1278_v3  ;;  %v1290_v50 = vand.u32 2147483648, %v1278_v3  ;;  %v1288_v56 = vand.u32 2147483647, %v1278_v3  ;;  %vm1284_vm12 = vweird.f32 %v1278_v3 }
 0x550   :  { %1865 = vrcp.f32 %v1323_v54  ;;  %1691 = vmatmul.msk.f32.vlgmr.msrb.gmra.mxu1 %vm746_vm9, %v1464_v6  ;;  %v1335_v45 = vand.u32 2147483648, %v1323_v54  ;;  %v1333_v13 = vand.u32 2147483647, %v1323_v54  ;;  %vm1329_vm10 = vweird.f32 %v1323_v54 }
 0x551   :  { %v1291_v35 = vor.u32 1.1754944e-38, %v1290_v50  ;;  %vm1289_vm15 = vcmp.eq.f32.partialorder %v1288_v56, 8.507059e+37 }
 0x552   :  { %v1336_v49 = vor.u32 1.1754944e-38, %v1335_v45  ;;  %vm1334_vm2 = vcmp.eq.f32.partialorder %v1333_v13, 8.507059e+37 }
 0x553   :  { %v1862_v18 = vpop.eup %1861 }
 0x554   :  { %v1395_v52 = vadd.f32 1.0, %v1862_v18 }
 0x555   :  { %v1864_v55 = vpop.eup %1863 }
 0x556   :  { %v1866_v48 = vpop.eup %1865  ;;  %v1280_v43 = vmul.f32 %v1864_v55, %v1278_v3  ;;  %1867 = vrcp.f32 %v1395_v52  ;;  %vm1285_vm1 = vweird.f32 %v1864_v55  ;;  %v1407_v9 = vand.u32 2147483648, %v1395_v52 }
 0x557   :  { %v1325_v25 = vmul.f32 %v1866_v48, %v1323_v54  ;;  %1869 = vtanh.f32 %v1363_v47  ;;  %vm1330_vm11 = vweird.f32 %v1866_v48  ;;  %vm1286_vm13 = vmor %vm1284_vm12, %vm1285_vm1  ;;  %vm1401_vm5 = vweird.f32 %v1395_v52 }
 0x558   :  { %v1281_v40 = vsub.f32 1.0, %v1280_v43  ;;  %vm1331_vm14 = vmor %vm1329_vm10, %vm1330_vm11  ;;  %v1405_v51 = vand.u32 2147483647, %v1395_v52  ;;  %v1408_v31 = vor.u32 1.1754944e-38, %v1407_v9  ;;  %v842_v43 = vadd.f32 %v1712_v1, %v2623_v14 }
 0x559   :  { %v1326_v10 = vsub.f32 1.0, %v1325_v25 }
 0x55a   :  { %v1282_v12 = vmul.f32 %v1864_v55, %v1281_v40  ;;  %vm1406_vm4 = vcmp.eq.f32.partialorder %v1405_v51, 8.507059e+37 }
 0x55b   :  { %v1327_v60 = vmul.f32 %v1866_v48, %v1326_v10 }
 0x55c   :  { %v1868_v20 = vpop.eup %1867  ;;  %v1283_v59 = vadd.f32 %v1864_v55, %v1282_v12 }
 0x55d   :  { %v1328_v42 = vadd.f32 %v1866_v48, %v1327_v60  ;;  %v1397_v61 = vmul.f32 %v1868_v20, %v1395_v52  ;;  %v1870_v38 = vpop.eup %1869  ;;  %vm1402_vm3 = vweird.f32 %v1868_v20  ;;  %v839_v52 = vadd.f32 %v1712_v1, %v2604_v11 }
 0x55e   :  { %v1287_v0 = vsel %vm1286_vm13, %v1864_v55, %v1283_v59  ;;  %vm1403_vm6 = vmor %vm1401_vm5, %vm1402_vm3 }
 0x55f   :  { %v1292_v29 = vsel %vm1289_vm15, %v1291_v35, %v1287_v0  ;;  %v1332_v2 = vsel %vm1331_vm14, %v1866_v48, %v1328_v42  ;;  %v1398_v4 = vsub.f32 1.0, %v1397_v61 }
 0x560   :  { %v1337_v28 = vsel %vm1334_vm2, %v1336_v49, %v1332_v2  ;;  %v1412_v22 = vmul.f32 %v1870_v38, %v1292_v29 }
 0x561   :  { %v1411_v19 = vmul.f32 %v1337_v28, %v2863_v37  ;;  %v1399_v63 = vmul.f32 %v1868_v20, %v1398_v4 }
 0x563   :  { %v1413_v30 = vadd.f32 %v1412_v22, %v1411_v19  ;;  %v1400_v24 = vadd.f32 %v1868_v20, %v1399_v63 }
 0x565   :  { %1871 = vtanh.f32 %v1413_v30  ;;  %v1404_v5 = vsel %vm1403_vm6, %v1868_v20, %v1400_v24 }
 0x566   :  { %v1409_v23 = vsel %vm1406_vm4, %v1408_v31, %v1404_v5 }
 0x56b   :  { %v1872_v57 = vpop.eup %1871 }
 0x56c   :  { %v1415_v7 = vmul.f32 %v1872_v57, %v1409_v23 }
 0x56e   :  { %1416 = vst.msk [vmem:[#allocation2 + $0x8] sm:$0xff] %vm489_vm8, %v1415_v7 }
 0x575   :  { %v1418_v36 = vld [vmem:[#allocation2 + $0x8] sm:$0xff] }
 0x576   :  { %1690 = vmatmul.msk.f32.gmra.mxu0 %vm489_vm8, %v1418_v36 }
 0x5cd   :  { %v1489_v37 = vpop.f32.mrf.mxu1 }
 0x5ce   :  { %v1490_v53 = vadd.f32 %v2514_v21, %v1489_v37 }
 0x5d0   :  { %v1495_v34 = vmax.f32 %v1490_v53, 0.0 }
 0x5d2   :  { %1693 = vmatmul.msk.f32.vlgmr.msrb.gmra.mxu2 %vm489_vm8, %v1495_v34 }
 0x5f3   :  { %v1447_v32 = vpop.f32.mrf.mxu0 }
 0x5f4   :  { %v1448_v8 = vadd.f32 %v1447_v32, %v2521_v62 }
 0x5f6   :  { %v1463_v16 = vadd.f32 %v1461_v39, %v1448_v8 }
 0x5f8   :  { %v1465_v26 = vmax.f32 %v1463_v16, 0.0 }
 0x5fa   :  { %1692 = vmatmul.msk.f32.gmra.mxu1 %vm746_vm9, %v1465_v26  ;;  %vm1565_vm9 = vcmask 7168  }
 0x655   :  { %v1520_v17 = vpop.f32.mrf.mxu2 }
 0x656   :  { %v1521_v33 = vadd.f32 %v2551_v27, %v1520_v17 }
 0x658   :  { %v1526_v41 = vmax.f32 %v1521_v33, 0.0 }
 0x65a   :  { %1695 = vmatmul.msk.f32.vlgmr.msrb.gmra.mxu3 %vm91_vm0, %v1526_v41 }
 0x677   :  { %v1492_v58 = vpop.f32.mrf.mxu1 }
 0x678   :  { %v1493_v44 = vadd.f32 %v2514_v21, %v1492_v58 }
 0x67a   :  { %v1496_v3 = vmax.f32 %v1493_v44, 0.0 }
 0x67c   :  { %1694 = vmatmul.msk.f32.gmra.mxu2 %vm489_vm8, %v1496_v3 }
 0x6dd   :  { %v1551_v54 = vpop.f32.mrf.mxu3 }
 0x6de   :  { %v1552_v6 = vadd.f32 %v1712_v1, %v1551_v54 }
 0x6e0   :  { %1559 = vrot.lane.b32.xlu0 %v1552_v6, %s1892_s1 }
 0x6ff   :  { %v1523_v62 = vpop.f32.mrf.mxu2 }
 0x700   :  { %v1524_v46 = vadd.f32 %v2551_v27, %v1523_v62 }
 0x702   :  { %v1527_v18 = vmax.f32 %v1524_v46, 0.0 }
 0x704   :  { %1696 = vmatmul.msk.f32.gmra.mxu3 %vm91_vm0, %v1527_v18 }
 0x752   :  { %v1560_v55 = vpop.permute.xlu0 %1559 }
 0x753   :  { %v1566_v21 = vsel %vm1565_vm9, %v839_v52, %v1560_v55 }
 0x754   :  { %1569 = vst.msk [vmem:[%s2953_s13] sm:$0xff] %vm1568_vm7, %v1566_v21 }
 0x787   :  { %v1554_v47 = vpop.f32.mrf.mxu3 }
 0x788   :  { %v1555_v48 = vadd.f32 %v1712_v1, %v1554_v47 }
 0x78a   :  { %1561 = vrot.lane.b32.xlu1 %v1555_v48, %s1892_s1 }
 0x7fc   :  { %v1562_v25 = vpop.permute.xlu1 %1561 }
 0x7fd   :  { %v1567_v27 = vsel %vm1565_vm9, %v842_v43, %v1562_v25 }
 0x7fe   :  { %1570 = vst.msk [vmem:[%s2953_s13 + $0x8] sm:$0xff] %vm1568_vm7, %v1567_v27 }

</bundles_post_ra>
